<compile_context>
chip_gen: v5e
topology: v5e:2x2
jax: 0.10.0
libtpu: 0.0.40
codegen_flags: <defaults>
</compile_context>

<pallas_src>
import functools

import jax
import jax.numpy as jnp
from jax.experimental import pallas as pl
from jax.experimental.pallas import tpu as pltpu

# ---- module hyper-parameters ----
IN_DIM = 4
OUT_DIM = 4          # fourier path assumes in_dim == out_dim (as in the PyTorch code)
N_MODES = 4
FACTOR = 2
LN_EPS = 1e-5

LANE_CHUNK = 512      # inner-loop chunk (lanes); bounds vreg live ranges
MAX_ROW_TILE = 16384  # max lanes per grid step (f32 input tile = 4 x 16384 x 4 B = 256 KiB)


def _round_up(a, b):
    return ((a + b - 1) // b) * b


# ----------------------------------------------------------------------------
# Pallas kernel 1: Fourier mode mixing as a single real matmul.
#   (Bp, 2*P*I) @ (2*P*I, 2*P*O)  with P = 2 * n_modes^2 kept mode positions.
# The block-diagonal weight encodes the complex multiply per mode.
# ----------------------------------------------------------------------------
def fourier_mix_kernel(x_ref, w_ref, o_ref):
    o_ref[...] = jnp.dot(x_ref[...], w_ref[...], preferred_element_type=jnp.float32)


def fourier_mix(x_flat, w_mat):
    bp = x_flat.shape[0]
    n = w_mat.shape[1]
    # ~256 KiB working set: whole-array VMEM residency, no grid needed.
    return pl.pallas_call(
        fourier_mix_kernel,
        out_shape=jax.ShapeDtypeStruct((bp, n), jnp.float32),
    )(x_flat, w_mat)


def build_fourier_mix_matrix(fourier_weight):
    """Block-diagonal real matrix equivalent to the per-mode complex mixing.

    Row index  = p*2I + (re_0..re_{I-1}, im_0..im_{I-1})
    Col index  = p*2O + (re_0..re_{O-1}, im_0..im_{O-1})
    with p = corner * nm*nm + x*nm + y over the two kept-mode corners.
    """
    nm, i_dim, o_dim = N_MODES, IN_DIM, OUT_DIM
    ws = jnp.stack(list(fourier_weight), axis=0)                      # (2, I, O, nm, nm, 2)
    wr = jnp.transpose(ws[..., 0], (0, 3, 4, 1, 2)).reshape(2 * nm * nm, i_dim, o_dim)
    wi = jnp.transpose(ws[..., 1], (0, 3, 4, 1, 2)).reshape(2 * nm * nm, i_dim, o_dim)
    top = jnp.concatenate([wr, wi], axis=2)                           # (P, I, 2O)
    bot = jnp.concatenate([-wi, wr], axis=2)                          # (P, I, 2O)
    blocks = jnp.concatenate([top, bot], axis=1)                      # (P, 2I, 2O)
    p = blocks.shape[0]
    eye = jnp.eye(p, dtype=blocks.dtype)
    w = jnp.einsum("pab,pq->paqb", blocks, eye)                       # block-diagonal
    return w.reshape(p * 2 * i_dim, p * 2 * o_dim)                    # (256, 256)


# ----------------------------------------------------------------------------
# Pallas kernel 2: fused backcast + forecast FeedForward
#   y = LayerNorm( ReLU(x @ W1^T + b1) @ W2^T + b2 )      (applied twice, shared input)
# Layout: (channels, rows) -- rows on the 128-lane axis, channels on sublanes.
# ----------------------------------------------------------------------------
def dual_ff_kernel(x_ref,
                   w1b_ref, b1b_ref, w2b_ref, b2b_ref, gb_ref, bb_ref,
                   w1f_ref, b1f_ref, w2f_ref, b2f_ref, gf_ref, bf_ref,
                   ob_ref, of_ref, *, chunk):
    d, tr = x_ref.shape
    h_dim = w1b_ref.shape[0]
    nchunks = tr // chunk

    # Tiny parameter tiles: load once per grid step.
    pb = (w1b_ref[...], b1b_ref[...], w2b_ref[...], b2b_ref[...], gb_ref[...], bb_ref[...])
    pf = (w1f_ref[...], b1f_ref[...], w2f_ref[...], b2f_ref[...], gf_ref[...], bf_ref[...])

    def ff(x, p):
        w1, b1, w2, b2, g, beta = p
        # layer 1: h[j, r] = relu(b1[j] + sum_i w1[j, i] * x[i, r])   (VPU broadcast FMAs)
        acc = jnp.broadcast_to(b1, (h_dim, chunk))
        for i in range(d):
            acc = acc + w1[:, i:i + 1] * x[i:i + 1, :]
        h = jnp.maximum(acc, 0.0)
        # layer 2: y[o, r] = b2[o] + sum_j w2[o, j] * h[j, r]
        y = jnp.broadcast_to(b2, (d, chunk))
        for j in range(h_dim):
            y = y + w2[:, j:j + 1] * h[j:j + 1, :]
        # LayerNorm over the channel (sublane) axis.
        mean = jnp.mean(y, axis=0, keepdims=True)
        var = jnp.mean(jnp.square(y - mean), axis=0, keepdims=True)
        return (y - mean) * jax.lax.rsqrt(var + LN_EPS) * g + beta

    def body(c, carry):
        col = pl.multiple_of(c * chunk, chunk)
        x = x_ref[:, pl.ds(col, chunk)]
        ob_ref[:, pl.ds(col, chunk)] = ff(x, pb)
        of_ref[:, pl.ds(col, chunk)] = ff(x, pf)
        return carry

    jax.lax.fori_loop(0, nchunks, body, 0)


def fused_feed_forward(x_cr, bc_params, fc_params):
    """x_cr: (D, R) float32, channels-on-sublanes / rows-on-lanes.  Returns two (D, R)."""
    d, r = x_cr.shape
    rp = _round_up(r, LANE_CHUNK)
    tile = min(MAX_ROW_TILE, rp)
    ntiles = pl.cdiv(rp, tile)
    rp = ntiles * tile                      # re-pad so the grid divides exactly (no assert)
    if rp != r:
        x_cr = jnp.pad(x_cr, ((0, 0), (0, rp - r)))

    row_spec = pl.BlockSpec((d, tile), lambda i: (0, i))

    def const_spec(a):
        return pl.BlockSpec(a.shape, lambda i: (0, 0))

    args = [x_cr]
    in_specs = [row_spec]
    for p in (bc_params, fc_params):
        for a in p:
            args.append(a)
            in_specs.append(const_spec(a))

    ob, of = pl.pallas_call(
        functools.partial(dual_ff_kernel, chunk=min(LANE_CHUNK, tile)),
        out_shape=(jax.ShapeDtypeStruct((d, rp), x_cr.dtype),
                   jax.ShapeDtypeStruct((d, rp), x_cr.dtype)),
        grid=(ntiles,),
        in_specs=in_specs,
        out_specs=(row_spec, row_spec),
        compiler_params=pltpu.CompilerParams(
            dimension_semantics=("parallel",),      # shards row tiles across v7x cores
            vmem_limit_bytes=32 * 1024 * 1024,      # footprint ~1.5 MiB double-buffered
        ),
    )(*args)
    return ob[:, :r], of[:, :r]


# ----------------------------------------------------------------------------
# forward_fourier: rfft2 -> Pallas mode-mix matmul -> irfft2
# ----------------------------------------------------------------------------
def forward_fourier(x, w_mix):
    b, m, n, i_dim = x.shape
    nm, o_dim = N_MODES, OUT_DIM

    xt = jnp.transpose(x, (0, 3, 1, 2))                               # b i m n
    x_ft = jnp.fft.rfft2(xt, s=(m, n), norm="ortho")                  # (B, I, M, N//2+1)

    # Gather the two kept-mode corners and flatten to (B, P*2I) real features.
    blk = jnp.stack([x_ft[:, :, :nm, :nm], x_ft[:, :, m - nm:, :nm]], axis=1)  # (B,2,I,nm,nm)
    xb = jnp.transpose(blk, (0, 1, 3, 4, 2))                          # (B, 2, nm, nm, I)
    xf = jnp.concatenate([jnp.real(xb), jnp.imag(xb)], axis=-1)       # (B, 2, nm, nm, 2I)
    xf = xf.reshape(b, 2 * nm * nm * 2 * i_dim).astype(jnp.float32)

    bp = _round_up(b, 8)                                              # pad rows for the MXU
    if bp != b:
        xf = jnp.pad(xf, ((0, bp - b), (0, 0)))
    y = fourier_mix(xf, w_mix)[:b]                                    # (B, P*2O)

    y = y.reshape(b, 2, nm, nm, 2 * o_dim)
    out_c = (y[..., :o_dim] + 1j * y[..., o_dim:]).astype(jnp.complex64)
    out_blocks = jnp.transpose(out_c, (1, 0, 4, 2, 3))                # (2, B, O, nm, nm)

    # Mirror the PyTorch allocation shape (B, C, N, M//2+1); identical when M == N.
    out_ft = jnp.zeros((b, o_dim, n, m // 2 + 1), dtype=jnp.complex64)
    out_ft = out_ft.at[:, :, :nm, :nm].set(out_blocks[0])
    out_ft = out_ft.at[:, :, n - nm:, :nm].set(out_blocks[1])

    # TODO(synk): rfft2/irfft2 have no Pallas primitive; done with jnp.fft (XLA).
    return jnp.fft.irfft2(out_ft, s=(m, n), norm="ortho")             # (B, O, M, N)


# ----------------------------------------------------------------------------
# Full SpectralConv2d forward (mode='full', use_fork=True)
# ----------------------------------------------------------------------------
@jax.jit
def spectral_conv2d_forward(x, params):
    b, m, n, _ = x.shape
    yf = forward_fourier(x, params["fourier_mix_matrix"])             # (B, O, M, N)
    o_dim = yf.shape[1]
    # Lane-dense layout for the fused FF: channels on sublanes, B*M*N rows on lanes.
    x_cr = jnp.transpose(yf, (1, 0, 2, 3)).reshape(o_dim, b * m * n)
    bc, fc = fused_feed_forward(x_cr, params["backcast_ff"], params["forecast_ff"])

    def to_bmnc(t):
        return jnp.transpose(t.reshape(o_dim, b, m, n), (1, 2, 3, 0))

    return to_bmnc(bc), to_bmnc(fc)                                   # 'b m n o' each


# ----------------------------------------------------------------------------
# Deterministic parameter init (synthetic; shapes match the module's __init__)
# ----------------------------------------------------------------------------
def init_params(key):
    nm = N_MODES
    keys = jax.random.split(key, 10)

    fan_in = IN_DIM * nm * nm
    fan_out = OUT_DIM * nm * nm
    std = (2.0 / (fan_in + fan_out)) ** 0.5
    fourier_weight = [
        std * jax.random.normal(keys[i], (IN_DIM, OUT_DIM, nm, nm, 2), jnp.float32)
        for i in range(2)
    ]

    # FeedForward(out_dim, factor=2, n_layers=2, layer_norm=True); weights stored
    # (out, in) like nn.Linear.
    # TODO(synk): WNLinear weight-norm parametrization (ff_weight_norm=True) not
    #             implemented; Dropout treated as eval-mode identity.
    def ff_params(ks):
        d, h = OUT_DIM, OUT_DIM * FACTOR
        w1 = jax.random.normal(ks[0], (h, d), jnp.float32) / jnp.sqrt(d)
        b1 = 0.01 * jax.random.normal(ks[1], (h,), jnp.float32)
        w2 = jax.random.normal(ks[2], (d, h), jnp.float32) / jnp.sqrt(h)
        b2 = 0.01 * jax.random.normal(ks[3], (d,), jnp.float32)
        gamma = jnp.ones((d,), jnp.float32)
        beta = jnp.zeros((d,), jnp.float32)
        return (w1, b1, w2, b2, gamma, beta)

    return {
        "fourier_weight": fourier_weight,
        "backcast_ff": ff_params(keys[2:6]),
        "forecast_ff": ff_params(keys[6:10]),
    }


def prepare_params(params):
    """One-time packing into kernel-ready layouts (kept out of the jitted per-call graph)."""
    def prep_ff(p):
        w1, b1, w2, b2, g, beta = p
        h, d = w1.shape
        return (w1,                    # (H, D): column i = weights for input channel i
                b1.reshape(h, 1),
                w2,                    # (D, H): column j = weights for hidden unit j
                b2.reshape(d, 1),
                g.reshape(d, 1),
                beta.reshape(d, 1))

    return {
        "fourier_mix_matrix": build_fourier_mix_matrix(params["fourier_weight"]),
        "backcast_ff": prep_ff(params["backcast_ff"]),
        "forecast_ff": prep_ff(params["forecast_ff"]),
    }


# ----------------------------------------------------------------------------
# Pure-JAX reference of the PyTorch forward (for a loose correctness check)
# ----------------------------------------------------------------------------
def reference_forward(x, params):
    b, m, n, _ = x.shape
    nm, o_dim = N_MODES, OUT_DIM
    xt = jnp.transpose(x, (0, 3, 1, 2))
    x_ft = jnp.fft.rfft2(xt, s=(m, n), norm="ortho")
    w0 = params["fourier_weight"][0][..., 0] + 1j * params["fourier_weight"][0][..., 1]
    w1 = params["fourier_weight"][1][..., 0] + 1j * params["fourier_weight"][1][..., 1]
    out_ft = jnp.zeros((b, o_dim, n, m // 2 + 1), jnp.complex64)
    out_ft = out_ft.at[:, :, :nm, :nm].set(
        jnp.einsum("bixy,ioxy->boxy", x_ft[:, :, :nm, :nm], w0,
                   precision=jax.lax.Precision.HIGHEST))
    out_ft = out_ft.at[:, :, n - nm:, :nm].set(
        jnp.einsum("bixy,ioxy->boxy", x_ft[:, :, m - nm:, :nm], w1,
                   precision=jax.lax.Precision.HIGHEST))
    y = jnp.fft.irfft2(out_ft, s=(m, n), norm="ortho")
    y = jnp.transpose(y, (0, 2, 3, 1))

    def ff(t, p):
        w1_, b1_, w2_, b2_, g_, be_ = p
        hh = jnp.maximum(t @ w1_.T + b1_, 0.0)
        z = hh @ w2_.T + b2_
        mu = jnp.mean(z, axis=-1, keepdims=True)
        var = jnp.mean(jnp.square(z - mu), axis=-1, keepdims=True)
        return (z - mu) * jax.lax.rsqrt(var + LN_EPS) * g_ + be_

    return ff(y, params["backcast_ff"]), ff(y, params["forecast_ff"])


if __name__ == "__main__":
    key = jax.random.PRNGKey(0)
    k_x, k_p = jax.random.split(key)

    B, M, N = 2, 16, 16
    # x is (B, M, N, C) channels-last, i.e. the module's 'b m n i' input layout
    x = jax.random.normal(k_x, (B, M, N, IN_DIM), jnp.float32)
    params = init_params(k_p)
    prepped = prepare_params(params)

    backcast, forecast = spectral_conv2d_forward(x, prepped)
    jax.block_until_ready((backcast, forecast))

    assert backcast.shape == (B, M, N, OUT_DIM)
    assert forecast.shape == (B, M, N, OUT_DIM)

    # Loose-tolerance check vs. a pure-JAX reference (catches layout/semantics bugs;
    # tolerance absorbs matmul-precision differences).
    ref_b, ref_f = reference_forward(x, params)
    err_b = float(jnp.max(jnp.abs(backcast - ref_b)))
    err_f = float(jnp.max(jnp.abs(forecast - ref_f)))
    assert err_b < 5e-2 and err_f < 5e-2, (err_b, err_f)

    print("KERNEL_OK")
</pallas_src>

<mosaic_0001>
module attributes {stable_mosaic.version = 11 : i64} {
  func.func @fourier_mix_kernel(%arg0: memref<8x256xf32, #tpu.memory_space<vmem>>, %arg1: memref<256x256xf32, #tpu.memory_space<vmem>>, %arg2: memref<8x256xf32, #tpu.memory_space<vmem>>) attributes {dimension_semantics = [], scalar_prefetch = 0 : i64, scratch_operands = 0 : i64, tpu.core_type = #tpu.core_type<tc>} {
    %c0 = arith.constant 0 : index
    %c0_0 = arith.constant 0 : index
    %0 = vector.load %arg0[%c0, %c0_0] : memref<8x256xf32, #tpu.memory_space<vmem>>, vector<8x256xf32>
    %c0_1 = arith.constant 0 : index
    %c0_2 = arith.constant 0 : index
    %1 = vector.load %arg1[%c0_1, %c0_2] : memref<256x256xf32, #tpu.memory_space<vmem>>, vector<256x256xf32>
    %cst = arith.constant dense<0.000000e+00> : vector<8x256xf32>
    %2 = tpu.matmul %0, %1, %cst {dimension_numbers = #tpu.dot_dimension_numbers<[1], [0], [0], [1], [0, 0, 1, 1], [], []>} : vector<8x256xf32>, vector<256x256xf32>, vector<8x256xf32> -> vector<8x256xf32>
    %c0_3 = arith.constant 0 : index
    %c0_4 = arith.constant 0 : index
    %3 = vector.load %arg2[%c0_3, %c0_4] : memref<8x256xf32, #tpu.memory_space<vmem>>, vector<8x256xf32>
    tpu.vector_store %arg2[%c0_3, %c0_4], %2 {strides = array<i32>} : memref<8x256xf32, #tpu.memory_space<vmem>>, vector<8x256xf32>,
    return
  }
}

module attributes {stable_mosaic.version = 11 : i64} {
  func.func @dual_ff_kernel(%arg0: i32, %arg1: memref<4x512xf32, #tpu.memory_space<vmem>>, %arg2: memref<8x4xf32, #tpu.memory_space<vmem>>, %arg3: memref<8x1xf32, #tpu.memory_space<vmem>>, %arg4: memref<4x8xf32, #tpu.memory_space<vmem>>, %arg5: memref<4x1xf32, #tpu.memory_space<vmem>>, %arg6: memref<4x1xf32, #tpu.memory_space<vmem>>, %arg7: memref<4x1xf32, #tpu.memory_space<vmem>>, %arg8: memref<8x4xf32, #tpu.memory_space<vmem>>, %arg9: memref<8x1xf32, #tpu.memory_space<vmem>>, %arg10: memref<4x8xf32, #tpu.memory_space<vmem>>, %arg11: memref<4x1xf32, #tpu.memory_space<vmem>>, %arg12: memref<4x1xf32, #tpu.memory_space<vmem>>, %arg13: memref<4x1xf32, #tpu.memory_space<vmem>>, %arg14: memref<4x512xf32, #tpu.memory_space<vmem>>, %arg15: memref<4x512xf32, #tpu.memory_space<vmem>>) attributes {dimension_semantics = [#tpu.dimension_semantics<parallel>], iteration_bounds = array<i64: 1>, scalar_prefetch = 0 : i64, scratch_operands = 0 : i64, tpu.core_type = #tpu.core_type<tc>, window_params = [{transform_indices = @transform_0, window_bounds = array<i64: 4, 512>}, {pipeline_mode = #tpu.pipeline_mode<synchronous>, transform_indices = @transform_1, window_bounds = array<i64: 8, 4>}, {pipeline_mode = #tpu.pipeline_mode<synchronous>, transform_indices = @transform_2, window_bounds = array<i64: 8, 1>}, {pipeline_mode = #tpu.pipeline_mode<synchronous>, transform_indices = @transform_3, window_bounds = array<i64: 4, 8>}, {pipeline_mode = #tpu.pipeline_mode<synchronous>, transform_indices = @transform_4, window_bounds = array<i64: 4, 1>}, {pipeline_mode = #tpu.pipeline_mode<synchronous>, transform_indices = @transform_5, window_bounds = array<i64: 4, 1>}, {pipeline_mode = #tpu.pipeline_mode<synchronous>, transform_indices = @transform_6, window_bounds = array<i64: 4, 1>}, {pipeline_mode = #tpu.pipeline_mode<synchronous>, transform_indices = @transform_7, window_bounds = array<i64: 8, 4>}, {pipeline_mode = #tpu.pipeline_mode<synchronous>, transform_indices = @transform_8, window_bounds = array<i64: 8, 1>}, {pipeline_mode = #tpu.pipeline_mode<synchronous>, transform_indices = @transform_9, window_bounds = array<i64: 4, 8>}, {pipeline_mode = #tpu.pipeline_mode<synchronous>, transform_indices = @transform_10, window_bounds = array<i64: 4, 1>}, {pipeline_mode = #tpu.pipeline_mode<synchronous>, transform_indices = @transform_11, window_bounds = array<i64: 4, 1>}, {pipeline_mode = #tpu.pipeline_mode<synchronous>, transform_indices = @transform_12, window_bounds = array<i64: 4, 1>}, {transform_indices = @transform_13, window_bounds = array<i64: 4, 512>}, {transform_indices = @transform_14, window_bounds = array<i64: 4, 512>}]} {
    %c0 = arith.constant 0 : index
    %c0_0 = arith.constant 0 : index
    %0 = vector.load %arg2[%c0, %c0_0] : memref<8x4xf32, #tpu.memory_space<vmem>>, vector<8x4xf32>
    %c0_1 = arith.constant 0 : index
    %c0_2 = arith.constant 0 : index
    %1 = vector.load %arg3[%c0_1, %c0_2] : memref<8x1xf32, #tpu.memory_space<vmem>>, vector<8x1xf32>
    %c0_3 = arith.constant 0 : index
    %c0_4 = arith.constant 0 : index
    %2 = vector.load %arg4[%c0_3, %c0_4] : memref<4x8xf32, #tpu.memory_space<vmem>>, vector<4x8xf32>
    %c0_5 = arith.constant 0 : index
    %c0_6 = arith.constant 0 : index
    %3 = vector.load %arg5[%c0_5, %c0_6] : memref<4x1xf32, #tpu.memory_space<vmem>>, vector<4x1xf32>
    %c0_7 = arith.constant 0 : index
    %c0_8 = arith.constant 0 : index
    %4 = vector.load %arg6[%c0_7, %c0_8] : memref<4x1xf32, #tpu.memory_space<vmem>>, vector<4x1xf32>
    %c0_9 = arith.constant 0 : index
    %c0_10 = arith.constant 0 : index
    %5 = vector.load %arg7[%c0_9, %c0_10] : memref<4x1xf32, #tpu.memory_space<vmem>>, vector<4x1xf32>
    %c0_11 = arith.constant 0 : index
    %c0_12 = arith.constant 0 : index
    %6 = vector.load %arg8[%c0_11, %c0_12] : memref<8x4xf32, #tpu.memory_space<vmem>>, vector<8x4xf32>
    %c0_13 = arith.constant 0 : index
    %c0_14 = arith.constant 0 : index
    %7 = vector.load %arg9[%c0_13, %c0_14] : memref<8x1xf32, #tpu.memory_space<vmem>>, vector<8x1xf32>
    %c0_15 = arith.constant 0 : index
    %c0_16 = arith.constant 0 : index
    %8 = vector.load %arg10[%c0_15, %c0_16] : memref<4x8xf32, #tpu.memory_space<vmem>>, vector<4x8xf32>
    %c0_17 = arith.constant 0 : index
    %c0_18 = arith.constant 0 : index
    %9 = vector.load %arg11[%c0_17, %c0_18] : memref<4x1xf32, #tpu.memory_space<vmem>>, vector<4x1xf32>
    %c0_19 = arith.constant 0 : index
    %c0_20 = arith.constant 0 : index
    %10 = vector.load %arg12[%c0_19, %c0_20] : memref<4x1xf32, #tpu.memory_space<vmem>>, vector<4x1xf32>
    %c0_21 = arith.constant 0 : index
    %c0_22 = arith.constant 0 : index
    %11 = vector.load %arg13[%c0_21, %c0_22] : memref<4x1xf32, #tpu.memory_space<vmem>>, vector<4x1xf32>
    %c0_i32 = arith.constant 0 : i32
    %c512_i32 = arith.constant 512 : i32
    %12 = arith.muli %c0_i32, %c512_i32 : i32
    %13 = tpu.assume_multiple %12, 512 : i32
    %c0_23 = arith.constant 0 : index
    %14 = arith.index_cast %13 : i32 to index
    %15 = vector.load %arg1[%c0_23, %14] : memref<4x512xf32, #tpu.memory_space<vmem>>, vector<4x512xf32>
    %16 = vector.shape_cast %1 : vector<8x1xf32> to vector<8x1xf32>
    %17 = vector.broadcast %16 : vector<8x1xf32> to vector<8x512xf32>
    %18 = vector.extract_strided_slice %0 {offsets = [0, 0], sizes = [8, 1], strides = [1, 1]} : vector<8x4xf32> to vector<8x1xf32>
    %19 = vector.extract_strided_slice %15 {offsets = [0, 0], sizes = [1, 512], strides = [1, 1]} : vector<4x512xf32> to vector<1x512xf32>
    %20 = vector.broadcast %18 : vector<8x1xf32> to vector<8x512xf32>
    %21 = vector.broadcast %19 : vector<1x512xf32> to vector<8x512xf32>
    %22 = arith.mulf %20, %21 : vector<8x512xf32>
    %23 = arith.addf %17, %22 : vector<8x512xf32>
    %24 = vector.extract_strided_slice %0 {offsets = [0, 1], sizes = [8, 1], strides = [1, 1]} : vector<8x4xf32> to vector<8x1xf32>
    %25 = vector.extract_strided_slice %15 {offsets = [1, 0], sizes = [1, 512], strides = [1, 1]} : vector<4x512xf32> to vector<1x512xf32>
    %26 = vector.broadcast %24 : vector<8x1xf32> to vector<8x512xf32>
    %27 = vector.broadcast %25 : vector<1x512xf32> to vector<8x512xf32>
    %28 = arith.mulf %26, %27 : vector<8x512xf32>
    %29 = arith.addf %23, %28 : vector<8x512xf32>
    %30 = vector.extract_strided_slice %0 {offsets = [0, 2], sizes = [8, 1], strides = [1, 1]} : vector<8x4xf32> to vector<8x1xf32>
    %31 = vector.extract_strided_slice %15 {offsets = [2, 0], sizes = [1, 512], strides = [1, 1]} : vector<4x512xf32> to vector<1x512xf32>
    %32 = vector.broadcast %30 : vector<8x1xf32> to vector<8x512xf32>
    %33 = vector.broadcast %31 : vector<1x512xf32> to vector<8x512xf32>
    %34 = arith.mulf %32, %33 : vector<8x512xf32>
    %35 = arith.addf %29, %34 : vector<8x512xf32>
    %36 = vector.extract_strided_slice %0 {offsets = [0, 3], sizes = [8, 1], strides = [1, 1]} : vector<8x4xf32> to vector<8x1xf32>
    %37 = vector.extract_strided_slice %15 {offsets = [3, 0], sizes = [1, 512], strides = [1, 1]} : vector<4x512xf32> to vector<1x512xf32>
    %38 = vector.broadcast %36 : vector<8x1xf32> to vector<8x512xf32>
    %39 = vector.broadcast %37 : vector<1x512xf32> to vector<8x512xf32>
    %40 = arith.mulf %38, %39 : vector<8x512xf32>
    %41 = arith.addf %35, %40 : vector<8x512xf32>
    %cst = arith.constant 0.000000e+00 : f32
    %42 = vector.broadcast %cst : f32 to vector<8x512xf32>
    %43 = arith.maximumf %41, %42 : vector<8x512xf32>
    %44 = vector.shape_cast %3 : vector<4x1xf32> to vector<4x1xf32>
    %45 = vector.broadcast %44 : vector<4x1xf32> to vector<4x512xf32>
    %46 = vector.extract_strided_slice %2 {offsets = [0, 0], sizes = [4, 1], strides = [1, 1]} : vector<4x8xf32> to vector<4x1xf32>
    %47 = vector.extract_strided_slice %43 {offsets = [0, 0], sizes = [1, 512], strides = [1, 1]} : vector<8x512xf32> to vector<1x512xf32>
    %48 = vector.broadcast %46 : vector<4x1xf32> to vector<4x512xf32>
    %49 = vector.broadcast %47 : vector<1x512xf32> to vector<4x512xf32>
    %50 = arith.mulf %48, %49 : vector<4x512xf32>
    %51 = arith.addf %45, %50 : vector<4x512xf32>
    %52 = vector.extract_strided_slice %2 {offsets = [0, 1], sizes = [4, 1], strides = [1, 1]} : vector<4x8xf32> to vector<4x1xf32>
    %53 = vector.extract_strided_slice %43 {offsets = [1, 0], sizes = [1, 512], strides = [1, 1]} : vector<8x512xf32> to vector<1x512xf32>
    %54 = vector.broadcast %52 : vector<4x1xf32> to vector<4x512xf32>
    %55 = vector.broadcast %53 : vector<1x512xf32> to vector<4x512xf32>
    %56 = arith.mulf %54, %55 : vector<4x512xf32>
    %57 = arith.addf %51, %56 : vector<4x512xf32>
    %58 = vector.extract_strided_slice %2 {offsets = [0, 2], sizes = [4, 1], strides = [1, 1]} : vector<4x8xf32> to vector<4x1xf32>
    %59 = vector.extract_strided_slice %43 {offsets = [2, 0], sizes = [1, 512], strides = [1, 1]} : vector<8x512xf32> to vector<1x512xf32>
    %60 = vector.broadcast %58 : vector<4x1xf32> to vector<4x512xf32>
    %61 = vector.broadcast %59 : vector<1x512xf32> to vector<4x512xf32>
    %62 = arith.mulf %60, %61 : vector<4x512xf32>
    %63 = arith.addf %57, %62 : vector<4x512xf32>
    %64 = vector.extract_strided_slice %2 {offsets = [0, 3], sizes = [4, 1], strides = [1, 1]} : vector<4x8xf32> to vector<4x1xf32>
    %65 = vector.extract_strided_slice %43 {offsets = [3, 0], sizes = [1, 512], strides = [1, 1]} : vector<8x512xf32> to vector<1x512xf32>
    %66 = vector.broadcast %64 : vector<4x1xf32> to vector<4x512xf32>
    %67 = vector.broadcast %65 : vector<1x512xf32> to vector<4x512xf32>
    %68 = arith.mulf %66, %67 : vector<4x512xf32>
    %69 = arith.addf %63, %68 : vector<4x512xf32>
    %70 = vector.extract_strided_slice %2 {offsets = [0, 4], sizes = [4, 1], strides = [1, 1]} : vector<4x8xf32> to vector<4x1xf32>
    %71 = vector.extract_strided_slice %43 {offsets = [4, 0], sizes = [1, 512], strides = [1, 1]} : vector<8x512xf32> to vector<1x512xf32>
    %72 = vector.broadcast %70 : vector<4x1xf32> to vector<4x512xf32>
    %73 = vector.broadcast %71 : vector<1x512xf32> to vector<4x512xf32>
    %74 = arith.mulf %72, %73 : vector<4x512xf32>
    %75 = arith.addf %69, %74 : vector<4x512xf32>
    %76 = vector.extract_strided_slice %2 {offsets = [0, 5], sizes = [4, 1], strides = [1, 1]} : vector<4x8xf32> to vector<4x1xf32>
    %77 = vector.extract_strided_slice %43 {offsets = [5, 0], sizes = [1, 512], strides = [1, 1]} : vector<8x512xf32> to vector<1x512xf32>
    %78 = vector.broadcast %76 : vector<4x1xf32> to vector<4x512xf32>
    %79 = vector.broadcast %77 : vector<1x512xf32> to vector<4x512xf32>
    %80 = arith.mulf %78, %79 : vector<4x512xf32>
    %81 = arith.addf %75, %80 : vector<4x512xf32>
    %82 = vector.extract_strided_slice %2 {offsets = [0, 6], sizes = [4, 1], strides = [1, 1]} : vector<4x8xf32> to vector<4x1xf32>
    %83 = vector.extract_strided_slice %43 {offsets = [6, 0], sizes = [1, 512], strides = [1, 1]} : vector<8x512xf32> to vector<1x512xf32>
    %84 = vector.broadcast %82 : vector<4x1xf32> to vector<4x512xf32>
    %85 = vector.broadcast %83 : vector<1x512xf32> to vector<4x512xf32>
    %86 = arith.mulf %84, %85 : vector<4x512xf32>
    %87 = arith.addf %81, %86 : vector<4x512xf32>
    %88 = vector.extract_strided_slice %2 {offsets = [0, 7], sizes = [4, 1], strides = [1, 1]} : vector<4x8xf32> to vector<4x1xf32>
    %89 = vector.extract_strided_slice %43 {offsets = [7, 0], sizes = [1, 512], strides = [1, 1]} : vector<8x512xf32> to vector<1x512xf32>
    %90 = vector.broadcast %88 : vector<4x1xf32> to vector<4x512xf32>
    %91 = vector.broadcast %89 : vector<1x512xf32> to vector<4x512xf32>
    %92 = arith.mulf %90, %91 : vector<4x512xf32>
    %93 = arith.addf %87, %92 : vector<4x512xf32>
    %cst_24 = arith.constant dense<0.000000e+00> : vector<512xf32>
    %94 = vector.multi_reduction <add>, %93, %cst_24 [0] : vector<4x512xf32> to vector<512xf32>
    %95 = vector.shape_cast %94 : vector<512xf32> to vector<1x512xf32>
    %cst_25 = arith.constant 4.000000e+00 : f32
    %96 = vector.broadcast %cst_25 : f32 to vector<1x512xf32>
    %97 = arith.divf %95, %96 : vector<1x512xf32>
    %98 = vector.broadcast %97 : vector<1x512xf32> to vector<4x512xf32>
    %99 = arith.subf %93, %98 : vector<4x512xf32>
    %100 = arith.mulf %99, %99 : vector<4x512xf32>
    %cst_26 = arith.constant dense<0.000000e+00> : vector<512xf32>
    %101 = vector.multi_reduction <add>, %100, %cst_26 [0] : vector<4x512xf32> to vector<512xf32>
    %102 = vector.shape_cast %101 : vector<512xf32> to vector<1x512xf32>
    %cst_27 = arith.constant 4.000000e+00 : f32
    %103 = vector.broadcast %cst_27 : f32 to vector<1x512xf32>
    %104 = arith.divf %102, %103 : vector<1x512xf32>
    %105 = vector.broadcast %97 : vector<1x512xf32> to vector<4x512xf32>
    %106 = arith.subf %93, %105 : vector<4x512xf32>
    %cst_28 = arith.constant 9.99999974E-6 : f32
    %107 = vector.broadcast %cst_28 : f32 to vector<1x512xf32>
    %108 = arith.addf %104, %107 : vector<1x512xf32>
    %109 = math.rsqrt %108 : vector<1x512xf32>
    %110 = vector.broadcast %109 : vector<1x512xf32> to vector<4x512xf32>
    %111 = arith.mulf %106, %110 : vector<4x512xf32>
    %112 = vector.broadcast %4 : vector<4x1xf32> to vector<4x512xf32>
    %113 = arith.mulf %111, %112 : vector<4x512xf32>
    %114 = vector.broadcast %5 : vector<4x1xf32> to vector<4x512xf32>
    %115 = arith.addf %113, %114 : vector<4x512xf32>
    %c0_29 = arith.constant 0 : index
    %116 = arith.index_cast %13 : i32 to index
    %117 = vector.load %arg14[%c0_29, %116] : memref<4x512xf32, #tpu.memory_space<vmem>>, vector<4x512xf32>
    tpu.vector_store %arg14[%c0_29, %116], %115 {strides = array<i32>} : memref<4x512xf32, #tpu.memory_space<vmem>>, vector<4x512xf32>,
    %118 = vector.shape_cast %7 : vector<8x1xf32> to vector<8x1xf32>
    %119 = vector.broadcast %118 : vector<8x1xf32> to vector<8x512xf32>
    %120 = vector.extract_strided_slice %6 {offsets = [0, 0], sizes = [8, 1], strides = [1, 1]} : vector<8x4xf32> to vector<8x1xf32>
    %121 = vector.extract_strided_slice %15 {offsets = [0, 0], sizes = [1, 512], strides = [1, 1]} : vector<4x512xf32> to vector<1x512xf32>
    %122 = vector.broadcast %120 : vector<8x1xf32> to vector<8x512xf32>
    %123 = vector.broadcast %121 : vector<1x512xf32> to vector<8x512xf32>
    %124 = arith.mulf %122, %123 : vector<8x512xf32>
    %125 = arith.addf %119, %124 : vector<8x512xf32>
    %126 = vector.extract_strided_slice %6 {offsets = [0, 1], sizes = [8, 1], strides = [1, 1]} : vector<8x4xf32> to vector<8x1xf32>
    %127 = vector.extract_strided_slice %15 {offsets = [1, 0], sizes = [1, 512], strides = [1, 1]} : vector<4x512xf32> to vector<1x512xf32>
    %128 = vector.broadcast %126 : vector<8x1xf32> to vector<8x512xf32>
    %129 = vector.broadcast %127 : vector<1x512xf32> to vector<8x512xf32>
    %130 = arith.mulf %128, %129 : vector<8x512xf32>
    %131 = arith.addf %125, %130 : vector<8x512xf32>
    %132 = vector.extract_strided_slice %6 {offsets = [0, 2], sizes = [8, 1], strides = [1, 1]} : vector<8x4xf32> to vector<8x1xf32>
    %133 = vector.extract_strided_slice %15 {offsets = [2, 0], sizes = [1, 512], strides = [1, 1]} : vector<4x512xf32> to vector<1x512xf32>
    %134 = vector.broadcast %132 : vector<8x1xf32> to vector<8x512xf32>
    %135 = vector.broadcast %133 : vector<1x512xf32> to vector<8x512xf32>
    %136 = arith.mulf %134, %135 : vector<8x512xf32>
    %137 = arith.addf %131, %136 : vector<8x512xf32>
    %138 = vector.extract_strided_slice %6 {offsets = [0, 3], sizes = [8, 1], strides = [1, 1]} : vector<8x4xf32> to vector<8x1xf32>
    %139 = vector.extract_strided_slice %15 {offsets = [3, 0], sizes = [1, 512], strides = [1, 1]} : vector<4x512xf32> to vector<1x512xf32>
    %140 = vector.broadcast %138 : vector<8x1xf32> to vector<8x512xf32>
    %141 = vector.broadcast %139 : vector<1x512xf32> to vector<8x512xf32>
    %142 = arith.mulf %140, %141 : vector<8x512xf32>
    %143 = arith.addf %137, %142 : vector<8x512xf32>
    %cst_30 = arith.constant 0.000000e+00 : f32
    %144 = vector.broadcast %cst_30 : f32 to vector<8x512xf32>
    %145 = arith.maximumf %143, %144 : vector<8x512xf32>
    %146 = vector.shape_cast %9 : vector<4x1xf32> to vector<4x1xf32>
    %147 = vector.broadcast %146 : vector<4x1xf32> to vector<4x512xf32>
    %148 = vector.extract_strided_slice %8 {offsets = [0, 0], sizes = [4, 1], strides = [1, 1]} : vector<4x8xf32> to vector<4x1xf32>
    %149 = vector.extract_strided_slice %145 {offsets = [0, 0], sizes = [1, 512], strides = [1, 1]} : vector<8x512xf32> to vector<1x512xf32>
    %150 = vector.broadcast %148 : vector<4x1xf32> to vector<4x512xf32>
    %151 = vector.broadcast %149 : vector<1x512xf32> to vector<4x512xf32>
    %152 = arith.mulf %150, %151 : vector<4x512xf32>
    %153 = arith.addf %147, %152 : vector<4x512xf32>
    %154 = vector.extract_strided_slice %8 {offsets = [0, 1], sizes = [4, 1], strides = [1, 1]} : vector<4x8xf32> to vector<4x1xf32>
    %155 = vector.extract_strided_slice %145 {offsets = [1, 0], sizes = [1, 512], strides = [1, 1]} : vector<8x512xf32> to vector<1x512xf32>
    %156 = vector.broadcast %154 : vector<4x1xf32> to vector<4x512xf32>
    %157 = vector.broadcast %155 : vector<1x512xf32> to vector<4x512xf32>
    %158 = arith.mulf %156, %157 : vector<4x512xf32>
    %159 = arith.addf %153, %158 : vector<4x512xf32>
    %160 = vector.extract_strided_slice %8 {offsets = [0, 2], sizes = [4, 1], strides = [1, 1]} : vector<4x8xf32> to vector<4x1xf32>
    %161 = vector.extract_strided_slice %145 {offsets = [2, 0], sizes = [1, 512], strides = [1, 1]} : vector<8x512xf32> to vector<1x512xf32>
    %162 = vector.broadcast %160 : vector<4x1xf32> to vector<4x512xf32>
    %163 = vector.broadcast %161 : vector<1x512xf32> to vector<4x512xf32>
    %164 = arith.mulf %162, %163 : vector<4x512xf32>
    %165 = arith.addf %159, %164 : vector<4x512xf32>
    %166 = vector.extract_strided_slice %8 {offsets = [0, 3], sizes = [4, 1], strides = [1, 1]} : vector<4x8xf32> to vector<4x1xf32>
    %167 = vector.extract_strided_slice %145 {offsets = [3, 0], sizes = [1, 512], strides = [1, 1]} : vector<8x512xf32> to vector<1x512xf32>
    %168 = vector.broadcast %166 : vector<4x1xf32> to vector<4x512xf32>
    %169 = vector.broadcast %167 : vector<1x512xf32> to vector<4x512xf32>
    %170 = arith.mulf %168, %169 : vector<4x512xf32>
    %171 = arith.addf %165, %170 : vector<4x512xf32>
    %172 = vector.extract_strided_slice %8 {offsets = [0, 4], sizes = [4, 1], strides = [1, 1]} : vector<4x8xf32> to vector<4x1xf32>
    %173 = vector.extract_strided_slice %145 {offsets = [4, 0], sizes = [1, 512], strides = [1, 1]} : vector<8x512xf32> to vector<1x512xf32>
    %174 = vector.broadcast %172 : vector<4x1xf32> to vector<4x512xf32>
    %175 = vector.broadcast %173 : vector<1x512xf32> to vector<4x512xf32>
    %176 = arith.mulf %174, %175 : vector<4x512xf32>
    %177 = arith.addf %171, %176 : vector<4x512xf32>
    %178 = vector.extract_strided_slice %8 {offsets = [0, 5], sizes = [4, 1], strides = [1, 1]} : vector<4x8xf32> to vector<4x1xf32>
    %179 = vector.extract_strided_slice %145 {offsets = [5, 0], sizes = [1, 512], strides = [1, 1]} : vector<8x512xf32> to vector<1x512xf32>
    %180 = vector.broadcast %178 : vector<4x1xf32> to vector<4x512xf32>
    %181 = vector.broadcast %179 : vector<1x512xf32> to vector<4x512xf32>
    %182 = arith.mulf %180, %181 : vector<4x512xf32>
    %183 = arith.addf %177, %182 : vector<4x512xf32>
    %184 = vector.extract_strided_slice %8 {offsets = [0, 6], sizes = [4, 1], strides = [1, 1]} : vector<4x8xf32> to vector<4x1xf32>
    %185 = vector.extract_strided_slice %145 {offsets = [6, 0], sizes = [1, 512], strides = [1, 1]} : vector<8x512xf32> to vector<1x512xf32>
    %186 = vector.broadcast %184 : vector<4x1xf32> to vector<4x512xf32>
    %187 = vector.broadcast %185 : vector<1x512xf32> to vector<4x512xf32>
    %188 = arith.mulf %186, %187 : vector<4x512xf32>
    %189 = arith.addf %183, %188 : vector<4x512xf32>
    %190 = vector.extract_strided_slice %8 {offsets = [0, 7], sizes = [4, 1], strides = [1, 1]} : vector<4x8xf32> to vector<4x1xf32>
    %191 = vector.extract_strided_slice %145 {offsets = [7, 0], sizes = [1, 512], strides = [1, 1]} : vector<8x512xf32> to vector<1x512xf32>
    %192 = vector.broadcast %190 : vector<4x1xf32> to vector<4x512xf32>
    %193 = vector.broadcast %191 : vector<1x512xf32> to vector<4x512xf32>
    %194 = arith.mulf %192, %193 : vector<4x512xf32>
    %195 = arith.addf %189, %194 : vector<4x512xf32>
    %cst_31 = arith.constant dense<0.000000e+00> : vector<512xf32>
    %196 = vector.multi_reduction <add>, %195, %cst_31 [0] : vector<4x512xf32> to vector<512xf32>
    %197 = vector.shape_cast %196 : vector<512xf32> to vector<1x512xf32>
    %cst_32 = arith.constant 4.000000e+00 : f32
    %198 = vector.broadcast %cst_32 : f32 to vector<1x512xf32>
    %199 = arith.divf %197, %198 : vector<1x512xf32>
    %200 = vector.broadcast %199 : vector<1x512xf32> to vector<4x512xf32>
    %201 = arith.subf %195, %200 : vector<4x512xf32>
    %202 = arith.mulf %201, %201 : vector<4x512xf32>
    %cst_33 = arith.constant dense<0.000000e+00> : vector<512xf32>
    %203 = vector.multi_reduction <add>, %202, %cst_33 [0] : vector<4x512xf32> to vector<512xf32>
    %204 = vector.shape_cast %203 : vector<512xf32> to vector<1x512xf32>
    %cst_34 = arith.constant 4.000000e+00 : f32
    %205 = vector.broadcast %cst_34 : f32 to vector<1x512xf32>
    %206 = arith.divf %204, %205 : vector<1x512xf32>
    %207 = vector.broadcast %199 : vector<1x512xf32> to vector<4x512xf32>
    %208 = arith.subf %195, %207 : vector<4x512xf32>
    %cst_35 = arith.constant 9.99999974E-6 : f32
    %209 = vector.broadcast %cst_35 : f32 to vector<1x512xf32>
    %210 = arith.addf %206, %209 : vector<1x512xf32>
    %211 = math.rsqrt %210 : vector<1x512xf32>
    %212 = vector.broadcast %211 : vector<1x512xf32> to vector<4x512xf32>
    %213 = arith.mulf %208, %212 : vector<4x512xf32>
    %214 = vector.broadcast %10 : vector<4x1xf32> to vector<4x512xf32>
    %215 = arith.mulf %213, %214 : vector<4x512xf32>
    %216 = vector.broadcast %11 : vector<4x1xf32> to vector<4x512xf32>
    %217 = arith.addf %215, %216 : vector<4x512xf32>
    %c0_36 = arith.constant 0 : index
    %218 = arith.index_cast %13 : i32 to index
    %219 = vector.load %arg15[%c0_36, %218] : memref<4x512xf32, #tpu.memory_space<vmem>>, vector<4x512xf32>
    tpu.vector_store %arg15[%c0_36, %218], %217 {strides = array<i32>} : memref<4x512xf32, #tpu.memory_space<vmem>>, vector<4x512xf32>,
    %c1_i32 = arith.constant 1 : i32
    return
  }
  func.func @transform_0(%arg0: i32) -> (i32, i32) {
    %c0_i32 = arith.constant 0 : i32
    %c0_i32_0 = arith.constant 0 : i32
    return %c0_i32, %arg0 : i32, i32
  }
  func.func @transform_1(%arg0: i32) -> (i32, i32) {
    %c0_i32 = arith.constant 0 : i32
    %c0_i32_0 = arith.constant 0 : i32
    %c0_i32_1 = arith.constant 0 : i32
    return %c0_i32, %c0_i32_0 : i32, i32
  }
  func.func @transform_2(%arg0: i32) -> (i32, i32) {
    %c0_i32 = arith.constant 0 : i32
    %c0_i32_0 = arith.constant 0 : i32
    %c0_i32_1 = arith.constant 0 : i32
    return %c0_i32, %c0_i32_0 : i32, i32
  }
  func.func @transform_3(%arg0: i32) -> (i32, i32) {
    %c0_i32 = arith.constant 0 : i32
    %c0_i32_0 = arith.constant 0 : i32
    %c0_i32_1 = arith.constant 0 : i32
    return %c0_i32, %c0_i32_0 : i32, i32
  }
  func.func @transform_4(%arg0: i32) -> (i32, i32) {
    %c0_i32 = arith.constant 0 : i32
    %c0_i32_0 = arith.constant 0 : i32
    %c0_i32_1 = arith.constant 0 : i32
    return %c0_i32, %c0_i32_0 : i32, i32
  }
  func.func @transform_5(%arg0: i32) -> (i32, i32) {
    %c0_i32 = arith.constant 0 : i32
    %c0_i32_0 = arith.constant 0 : i32
    %c0_i32_1 = arith.constant 0 : i32
    return %c0_i32, %c0_i32_0 : i32, i32
  }
  func.func @transform_6(%arg0: i32) -> (i32, i32) {
    %c0_i32 = arith.constant 0 : i32
    %c0_i32_0 = arith.constant 0 : i32
    %c0_i32_1 = arith.constant 0 : i32
    return %c0_i32, %c0_i32_0 : i32, i32
  }
  func.func @transform_7(%arg0: i32) -> (i32, i32) {
    %c0_i32 = arith.constant 0 : i32
    %c0_i32_0 = arith.constant 0 : i32
    %c0_i32_1 = arith.constant 0 : i32
    return %c0_i32, %c0_i32_0 : i32, i32
  }
  func.func @transform_8(%arg0: i32) -> (i32, i32) {
    %c0_i32 = arith.constant 0 : i32
    %c0_i32_0 = arith.constant 0 : i32
    %c0_i32_1 = arith.constant 0 : i32
    return %c0_i32, %c0_i32_0 : i32, i32
  }
  func.func @transform_9(%arg0: i32) -> (i32, i32) {
    %c0_i32 = arith.constant 0 : i32
    %c0_i32_0 = arith.constant 0 : i32
    %c0_i32_1 = arith.constant 0 : i32
    return %c0_i32, %c0_i32_0 : i32, i32
  }
  func.func @transform_10(%arg0: i32) -> (i32, i32) {
    %c0_i32 = arith.constant 0 : i32
    %c0_i32_0 = arith.constant 0 : i32
    %c0_i32_1 = arith.constant 0 : i32
    return %c0_i32, %c0_i32_0 : i32, i32
  }
  func.func @transform_11(%arg0: i32) -> (i32, i32) {
    %c0_i32 = arith.constant 0 : i32
    %c0_i32_0 = arith.constant 0 : i32
    %c0_i32_1 = arith.constant 0 : i32
    return %c0_i32, %c0_i32_0 : i32, i32
  }
  func.func @transform_12(%arg0: i32) -> (i32, i32) {
    %c0_i32 = arith.constant 0 : i32
    %c0_i32_0 = arith.constant 0 : i32
    %c0_i32_1 = arith.constant 0 : i32
    return %c0_i32, %c0_i32_0 : i32, i32
  }
  func.func @transform_13(%arg0: i32) -> (i32, i32) {
    %c0_i32 = arith.constant 0 : i32
    %c0_i32_0 = arith.constant 0 : i32
    return %c0_i32, %arg0 : i32, i32
  }
  func.func @transform_14(%arg0: i32) -> (i32, i32) {
    %c0_i32 = arith.constant 0 : i32
    %c0_i32_0 = arith.constant 0 : i32
    return %c0_i32, %arg0 : i32, i32
  }
}

</mosaic_0001>

<bundles_post_ra>
// kernel: spectral_conv2d_forward.2
= control target key start
LH: loop header
LB: loop body
LE: loop exit
PB: predicated region body
PF: predicated region fallthrough
CT: control target
= control target key end

     0   :  { %s382_s1 = inlined_call_operand.vmem [shape: f32[256,256], index: 1, kind: input, shape index: {}]   ;;  %s383_s0 = inlined_call_operand.vmem [shape: f32[8,256], index: 0, kind: input, shape index: {}]   ;;  %s384_s2 = inlined_call_operand.vmem [shape: f32[8,256], index: 2, kind: output, shape index: {}]  }
   0x1   :  { %v44_v0 = vld [vmem:[%s382_s1 + $0xf8] sm:$0xff]  ;;  %v42_v2 = vld [vmem:[%s382_s1 + $0xe8] sm:$0xff]  ;;  %v43_v6 = vld [vmem:[%s382_s1 + $0xf0] sm:$0xff] }
   0x2   :  { %v76_v1 = vld [vmem:[%s382_s1 + $0x1f8] sm:$0xff]  ;;  %117 = vmatpush.msra.mxu2 %v44_v0  ;;  %v74_v3 = vld [vmem:[%s382_s1 + $0x1e8] sm:$0xff]  ;;  %v75_v7 = vld [vmem:[%s382_s1 + $0x1f0] sm:$0xff]  ;;  %77 = vmatpush.msra.mxu0 %v43_v6 }
   0x3   :  { %137 = vmatpush.msra.mxu3 %v76_v1  ;;  %v40_v4 = vld [vmem:[%s382_s1 + $0xd8] sm:$0xff]  ;;  %v41_v8 = vld [vmem:[%s382_s1 + $0xe0] sm:$0xff]  ;;  %97 = vmatpush.msra.mxu1 %v75_v7  ;;  %v38_v10 = vld [vmem:[%s382_s1 + $0xc8] sm:$0xff] }
   0x4   :  { %v72_v5 = vld [vmem:[%s382_s1 + $0x1d8] sm:$0xff]  ;;  %118 = vmatpush.msra.mxu2 %v42_v2  ;;  %v73_v9 = vld [vmem:[%s382_s1 + $0x1e0] sm:$0xff]  ;;  %v70_v11 = vld [vmem:[%s382_s1 + $0x1c8] sm:$0xff]  ;;  %78 = vmatpush.msra.mxu0 %v41_v8 }
   0x5   :  { %138 = vmatpush.msra.mxu3 %v74_v3  ;;  %v39_v12 = vld [vmem:[%s382_s1 + $0xd0] sm:$0xff]  ;;  %98 = vmatpush.msra.mxu1 %v73_v9  ;;  %v36_v14 = vld [vmem:[%s382_s1 + $0xb8] sm:$0xff]  ;;  %v37_v16 = vld [vmem:[%s382_s1 + $0xc0] sm:$0xff] }
   0x6   :  { %119 = vmatpush.msra.mxu2 %v40_v4  ;;  %v71_v13 = vld [vmem:[%s382_s1 + $0x1d0] sm:$0xff]  ;;  %v68_v15 = vld [vmem:[%s382_s1 + $0x1b8] sm:$0xff]  ;;  %v69_v17 = vld [vmem:[%s382_s1 + $0x1c0] sm:$0xff]  ;;  %79 = vmatpush.msra.mxu0 %v39_v12 }
   0x7   :  { %139 = vmatpush.msra.mxu3 %v72_v5  ;;  %99 = vmatpush.msra.mxu1 %v71_v13  ;;  %v34_v18 = vld [vmem:[%s382_s1 + $0xa8] sm:$0xff]  ;;  %v35_v20 = vld [vmem:[%s382_s1 + $0xb0] sm:$0xff]  ;;  %v32_v22 = vld [vmem:[%s382_s1 + $0x98] sm:$0xff] }
   0x8   :  { %120 = vmatpush.msra.mxu2 %v38_v10  ;;  %v66_v19 = vld [vmem:[%s382_s1 + $0x1a8] sm:$0xff]  ;;  %v67_v21 = vld [vmem:[%s382_s1 + $0x1b0] sm:$0xff]  ;;  %80 = vmatpush.msra.mxu0 %v37_v16  ;;  %v64_v23 = vld [vmem:[%s382_s1 + $0x198] sm:$0xff] }
   0x9   :  { %140 = vmatpush.msra.mxu3 %v70_v11  ;;  %100 = vmatpush.msra.mxu1 %v69_v17  ;;  %v33_v24 = vld [vmem:[%s382_s1 + $0xa0] sm:$0xff]  ;;  %v30_v26 = vld [vmem:[%s382_s1 + $0x88] sm:$0xff]  ;;  %v31_v28 = vld [vmem:[%s382_s1 + $0x90] sm:$0xff] }
   0xa   :  { %121 = vmatpush.msra.mxu2 %v36_v14  ;;  %v65_v25 = vld [vmem:[%s382_s1 + $0x1a0] sm:$0xff]  ;;  %81 = vmatpush.msra.mxu0 %v35_v20  ;;  %v62_v27 = vld [vmem:[%s382_s1 + $0x188] sm:$0xff]  ;;  %v63_v29 = vld [vmem:[%s382_s1 + $0x190] sm:$0xff] }
   0xb   :  { %141 = vmatpush.msra.mxu3 %v68_v15  ;;  %101 = vmatpush.msra.mxu1 %v67_v21  ;;  %v28_v30 = vld [vmem:[%s382_s1 + $0x78] sm:$0xff]  ;;  %v29_v32 = vld [vmem:[%s382_s1 + $0x80] sm:$0xff]  ;;  %v26_v34 = vld [vmem:[%s382_s1 + $0x68] sm:$0xff] }
   0xc   :  { %122 = vmatpush.msra.mxu2 %v34_v18  ;;  %82 = vmatpush.msra.mxu0 %v33_v24  ;;  %v60_v31 = vld [vmem:[%s382_s1 + $0x178] sm:$0xff]  ;;  %v61_v33 = vld [vmem:[%s382_s1 + $0x180] sm:$0xff]  ;;  %v58_v35 = vld [vmem:[%s382_s1 + $0x168] sm:$0xff] }
   0xd   :  { %142 = vmatpush.msra.mxu3 %v66_v19  ;;  %102 = vmatpush.msra.mxu1 %v65_v25  ;;  %v27_v36 = vld [vmem:[%s382_s1 + $0x70] sm:$0xff]  ;;  %v24_v38 = vld [vmem:[%s382_s1 + $0x58] sm:$0xff]  ;;  %v25_v40 = vld [vmem:[%s382_s1 + $0x60] sm:$0xff] }
   0xe   :  { %123 = vmatpush.msra.mxu2 %v32_v22  ;;  %83 = vmatpush.msra.mxu0 %v31_v28  ;;  %v59_v37 = vld [vmem:[%s382_s1 + $0x170] sm:$0xff]  ;;  %v56_v39 = vld [vmem:[%s382_s1 + $0x158] sm:$0xff]  ;;  %v57_v41 = vld [vmem:[%s382_s1 + $0x160] sm:$0xff] }
   0xf   :  { %143 = vmatpush.msra.mxu3 %v64_v23  ;;  %103 = vmatpush.msra.mxu1 %v63_v29  ;;  %v22_v42 = vld [vmem:[%s382_s1 + $0x48] sm:$0xff]  ;;  %v23_v44 = vld [vmem:[%s382_s1 + $0x50] sm:$0xff]  ;;  %v20_v46 = vld [vmem:[%s382_s1 + $0x38] sm:$0xff] }
  0x10   :  { %124 = vmatpush.msra.mxu2 %v30_v26  ;;  %84 = vmatpush.msra.mxu0 %v29_v32  ;;  %v54_v43 = vld [vmem:[%s382_s1 + $0x148] sm:$0xff]  ;;  %v55_v45 = vld [vmem:[%s382_s1 + $0x150] sm:$0xff]  ;;  %v52_v47 = vld [vmem:[%s382_s1 + $0x138] sm:$0xff] }
  0x11   :  { %144 = vmatpush.msra.mxu3 %v62_v27  ;;  %104 = vmatpush.msra.mxu1 %v61_v33  ;;  %v21_v48 = vld [vmem:[%s382_s1 + $0x40] sm:$0xff]  ;;  %v18_v50 = vld [vmem:[%s382_s1 + $0x28] sm:$0xff]  ;;  %v19_v52 = vld [vmem:[%s382_s1 + $0x30] sm:$0xff] }
  0x12   :  { %125 = vmatpush.msra.mxu2 %v28_v30  ;;  %85 = vmatpush.msra.mxu0 %v27_v36  ;;  %v53_v49 = vld [vmem:[%s382_s1 + $0x140] sm:$0xff]  ;;  %v50_v51 = vld [vmem:[%s382_s1 + $0x128] sm:$0xff]  ;;  %v51_v53 = vld [vmem:[%s382_s1 + $0x130] sm:$0xff] }
  0x13   :  { %145 = vmatpush.msra.mxu3 %v60_v31  ;;  %105 = vmatpush.msra.mxu1 %v59_v37  ;;  %v16_v54 = vld [vmem:[%s382_s1 + $0x18] sm:$0xff]  ;;  %v17_v56 = vld [vmem:[%s382_s1 + $0x20] sm:$0xff]  ;;  %v14_v58 = vld [vmem:[%s382_s1 + $0x8] sm:$0xff] }
  0x14   :  { %126 = vmatpush.msra.mxu2 %v26_v34  ;;  %86 = vmatpush.msra.mxu0 %v25_v40  ;;  %v48_v55 = vld [vmem:[%s382_s1 + $0x118] sm:$0xff]  ;;  %v49_v57 = vld [vmem:[%s382_s1 + $0x120] sm:$0xff]  ;;  %v46_v59 = vld [vmem:[%s382_s1 + $0x108] sm:$0xff] }
  0x15   :  { %146 = vmatpush.msra.mxu3 %v58_v35  ;;  %106 = vmatpush.msra.mxu1 %v57_v41  ;;  %v11_v60 = vld [vmem:[%s383_s0] sm:$0xff]  ;;  %v12_v61 = vld [vmem:[%s383_s0 + $0x8] sm:$0xff]  ;;  %v15_v62 = vld [vmem:[%s382_s1 + $0x10] sm:$0xff] }
  0x16   :  { %127 = vmatpush.msra.mxu2 %v24_v38  ;;  %87 = vmatpush.msra.mxu0 %v23_v44  ;;  %v47_v63 = vld [vmem:[%s382_s1 + $0x110] sm:$0xff]  ;;  %v13_v0 = vld [vmem:[%s382_s1] sm:$0xff] }
  0x17   :  { %147 = vmatpush.msra.mxu3 %v56_v39  ;;  %107 = vmatpush.msra.mxu1 %v55_v45  ;;  %v45_v1 = vld [vmem:[%s382_s1 + $0x100] sm:$0xff] }
  0x18   :  { %128 = vmatpush.msra.mxu2 %v22_v42  ;;  %88 = vmatpush.msra.mxu0 %v21_v48 }
  0x19   :  { %148 = vmatpush.msra.mxu3 %v54_v43  ;;  %108 = vmatpush.msra.mxu1 %v53_v49 }
  0x1a   :  { %129 = vmatpush.msra.mxu2 %v20_v46  ;;  %89 = vmatpush.msra.mxu0 %v19_v52 }
  0x1b   :  { %149 = vmatpush.msra.mxu3 %v52_v47  ;;  %109 = vmatpush.msra.mxu1 %v51_v53 }
  0x1c   :  { %130 = vmatpush.msra.mxu2 %v18_v50  ;;  %90 = vmatpush.msra.mxu0 %v17_v56 }
  0x1d   :  { %150 = vmatpush.msra.mxu3 %v50_v51  ;;  %110 = vmatpush.msra.mxu1 %v49_v57 }
  0x1e   :  { %131 = vmatpush.msra.mxu2 %v16_v54  ;;  %91 = vmatpush.msra.mxu0 %v15_v62 }
  0x1f   :  { %151 = vmatpush.msra.mxu3 %v48_v55  ;;  %111 = vmatpush.msra.mxu1 %v47_v63 }
  0x20   :  { %132 = vmatpush.msra.mxu2 %v14_v58  ;;  %92 = vmatpush.msra.mxu0 %v13_v0 }
  0x21   :  { %152 = vmatpush.msra.mxu3 %v46_v59  ;;  %133 = vmatmul.f32.vlgmr.msra.gmra.mxu2 %v11_v60 }
  0x22   :  { %153 = vmatmul.f32.vlgmr.msra.gmra.mxu3 %v12_v61  ;;  %112 = vmatpush.msra.mxu1 %v45_v1 }
  0x23   :  { %93 = vmatmul.f32.vlgmr.msra.gmra.mxu0 %v11_v60  ;;  %113 = vmatmul.f32.vlgmr.msra.gmra.mxu1 %v12_v61 }
  0xa0   :  { %v94_v2 = vpop.f32.mrf.mxu0  ;;  %v114_v3 = vpop.f32.mrf.mxu1 }
  0xa1   :  { %v115_v4 = vadd.f32 %v114_v3, %v94_v2 }
  0xa3   :  { %157 = vst [vmem:[%s384_s2] sm:$0xff] %v115_v4 }
  0xa4   :  { %v134_v5 = vpop.f32.mrf.mxu2 }
  0xa5   :  { %v154_v6 = vpop.f32.mrf.mxu3 }
  0xa6   :  { %v155_v7 = vadd.f32 %v154_v6, %v134_v5 }
  0xa8   :  { %158 = vst [vmem:[%s384_s2 + $0x8] sm:$0xff] %v155_v7 }

// kernel: reverse.0
= control target key start
LH: loop header
LB: loop body
LE: loop exit
PB: predicated region body
PF: predicated region fallthrough
CT: control target
= control target key end

     0   :  { %v72_v3 = vlaneseq  ;;  %v65_v6 = vld [vmem:[#allocation0 + $0x7] ss:$-1 sm:$0xff]  ;;  %v79_v8 = vld [vmem:[#allocation0 + $0x17] ss:$-1 sm:$0xff]  ;;  %s331_s0 = inlined_call_operand.vmem [shape: f32[2,4,16,7], index: 0, kind: input, shape index: {}]   ;;  %s332_s1 = inlined_call_operand.vmem [shape: f32[2,4,16,7], index: 1, kind: output, shape index: {}]  }
   0x1   :  { %v45_v0 = vld [vmem:[%s331_s0] sm:$0xff]  ;;  %v47_v1 = vld [vmem:[%s331_s0 + $0x8] sm:$0xff]  ;;  %v49_v2 = vld [vmem:[%s331_s0 + $0x10] sm:$0xff]  ;;  %v66_v12 = vrot.slane %v65_v6, 1  ;;  %v80_v13 = vrot.slane %v79_v8, 1 }
   0x2   :  { %46 = vst [vmem:[#allocation0 + $0x8] sm:$0xff] %v45_v0  ;;  %v51_v4 = vld [vmem:[%s331_s0 + $0x18] sm:$0xff]  ;;  %v53_v5 = vld [vmem:[%s331_s0 + $0x20] sm:$0xff]  ;;  %v55_v7 = vld [vmem:[%s331_s0 + $0x28] sm:$0xff]  ;;  %v73_v10 = vshrl.u32 %v72_v3, 7 }
   0x3   :  { %48 = vst [vmem:[#allocation0 + $0x18] sm:$0xff] %v47_v1  ;;  %v57_v9 = vld [vmem:[%s331_s0 + $0x30] sm:$0xff]  ;;  %v59_v11 = vld [vmem:[%s331_s0 + $0x38] sm:$0xff]  ;;  %v93_v14 = vld [vmem:[#allocation0 + $0x27] ss:$-1 sm:$0xff] }
   0x4   :  { %50 = vst [vmem:[#allocation0 + $0x28] sm:$0xff] %v49_v2  ;;  %vm74_vm0 = vcmp.lt.s32.totalorder %v73_v10, 7  ;;  %v107_v16 = vld [vmem:[#allocation0 + $0x37] ss:$-1 sm:$0xff]  ;;  %v94_v19 = vrot.slane %v93_v14, 1 }
   0x5   :  { %52 = vst [vmem:[#allocation0 + $0x38] sm:$0xff] %v51_v4  ;;  %v121_v22 = vld [vmem:[#allocation0 + $0x47] ss:$-1 sm:$0xff]  ;;  %v108_v24 = vrot.slane %v107_v16, 1  ;;  %v135_v28 = vld [vmem:[#allocation0 + $0x57] ss:$-1 sm:$0xff] }
   0x6   :  { %54 = vst [vmem:[#allocation0 + $0x48] sm:$0xff] %v53_v5  ;;  %v122_v29 = vrot.slane %v121_v22, 1  ;;  %v149_v32 = vld [vmem:[#allocation0 + $0x67] ss:$-1 sm:$0xff]  ;;  %v136_v33 = vrot.slane %v135_v28, 1 }
   0x7   :  { %56 = vst [vmem:[#allocation0 + $0x58] sm:$0xff] %v55_v7  ;;  %v163_v36 = vld [vmem:[#allocation0 + $0x77] ss:$-1 sm:$0xff]  ;;  %v150_v37 = vrot.slane %v149_v32, 1 }
   0x8   :  { %58 = vst [vmem:[#allocation0 + $0x68] sm:$0xff] %v57_v9  ;;  %v164_v40 = vrot.slane %v163_v36, 1 }
   0x9   :  { %60 = vst [vmem:[#allocation0 + $0x78] sm:$0xff] %v59_v11  ;;  %v70_v15 = vld [vmem:[#allocation0 + $0xf] ss:$-1 sm:$0xff] }
   0xa   :  { %67 = vst [vmem:[#allocation1] sm:$0xff] %v66_v12  ;;  %v71_v17 = vrot.slane %v70_v15, 1  ;;  %v84_v18 = vld [vmem:[#allocation0 + $0x1f] ss:$-1 sm:$0xff] }
   0xb   :  { %81 = vst [vmem:[#allocation1 + $0x8] sm:$0xff] %v80_v13  ;;  %v85_v20 = vrot.slane %v84_v18, 1  ;;  %v98_v21 = vld [vmem:[#allocation0 + $0x2f] ss:$-1 sm:$0xff] }
   0xc   :  { %75 = vst.msk [vmem:[#allocation1] sm:$0xff] %vm74_vm0, %v71_v17  ;;  %v99_v23 = vrot.slane %v98_v21, 1  ;;  %v112_v25 = vld [vmem:[#allocation0 + $0x3f] ss:$-1 sm:$0xff] }
   0xd   :  { %89 = vst.msk [vmem:[#allocation1 + $0x8] sm:$0xff] %vm74_vm0, %v85_v20  ;;  %v113_v26 = vrot.slane %v112_v25, 1  ;;  %v126_v27 = vld [vmem:[#allocation0 + $0x4f] ss:$-1 sm:$0xff] }
   0xe   :  { %95 = vst [vmem:[#allocation1 + $0x10] sm:$0xff] %v94_v19  ;;  %v140_v30 = vld [vmem:[#allocation0 + $0x5f] ss:$-1 sm:$0xff]  ;;  %v127_v31 = vrot.slane %v126_v27, 1 }
   0xf   :  { %103 = vst.msk [vmem:[#allocation1 + $0x10] sm:$0xff] %vm74_vm0, %v99_v23  ;;  %v154_v34 = vld [vmem:[#allocation0 + $0x6f] ss:$-1 sm:$0xff]  ;;  %v141_v35 = vrot.slane %v140_v30, 1 }
  0x10   :  { %109 = vst [vmem:[#allocation1 + $0x18] sm:$0xff] %v108_v24  ;;  %v168_v38 = vld [vmem:[#allocation0 + $0x7f] ss:$-1 sm:$0xff]  ;;  %v155_v39 = vrot.slane %v154_v34, 1 }
  0x11   :  { %117 = vst.msk [vmem:[#allocation1 + $0x18] sm:$0xff] %vm74_vm0, %v113_v26  ;;  %v169_v41 = vrot.slane %v168_v38, 1 }
  0x12   :  { %123 = vst [vmem:[#allocation1 + $0x20] sm:$0xff] %v122_v29 }
  0x13   :  { %131 = vst.msk [vmem:[#allocation1 + $0x20] sm:$0xff] %vm74_vm0, %v127_v31  ;;  %v216_v42 = vld [vmem:[#allocation1] sm:$0xff] }
  0x14   :  { %137 = vst [vmem:[#allocation1 + $0x28] sm:$0xff] %v136_v33  ;;  %v218_v43 = vld [vmem:[#allocation1 + $0x8] sm:$0xff] }
  0x15   :  { %145 = vst.msk [vmem:[#allocation1 + $0x28] sm:$0xff] %vm74_vm0, %v141_v35 }
  0x16   :  { %151 = vst [vmem:[#allocation1 + $0x30] sm:$0xff] %v150_v37  ;;  %v220_v44 = vld [vmem:[#allocation1 + $0x10] sm:$0xff] }
  0x17   :  { %159 = vst.msk [vmem:[#allocation1 + $0x30] sm:$0xff] %vm74_vm0, %v155_v39 }
  0x18   :  { %165 = vst [vmem:[#allocation1 + $0x38] sm:$0xff] %v164_v40  ;;  %v222_v45 = vld [vmem:[#allocation1 + $0x18] sm:$0xff] }
  0x19   :  { %173 = vst.msk [vmem:[#allocation1 + $0x38] sm:$0xff] %vm74_vm0, %v169_v41 }
  0x1a   :  { %217 = vst [vmem:[%s332_s1] sm:$0xff] %v216_v42  ;;  %v224_v46 = vld [vmem:[#allocation1 + $0x20] sm:$0xff] }
  0x1b   :  { %219 = vst [vmem:[%s332_s1 + $0x8] sm:$0xff] %v218_v43 }
  0x1c   :  { %221 = vst [vmem:[%s332_s1 + $0x10] sm:$0xff] %v220_v44  ;;  %v226_v47 = vld [vmem:[#allocation1 + $0x28] sm:$0xff] }
  0x1d   :  { %223 = vst [vmem:[%s332_s1 + $0x18] sm:$0xff] %v222_v45 }
  0x1e   :  { %225 = vst [vmem:[%s332_s1 + $0x20] sm:$0xff] %v224_v46  ;;  %v228_v48 = vld [vmem:[#allocation1 + $0x30] sm:$0xff] }
  0x1f   :  { %227 = vst [vmem:[%s332_s1 + $0x28] sm:$0xff] %v226_v47 }
  0x20   :  { %229 = vst [vmem:[%s332_s1 + $0x30] sm:$0xff] %v228_v48  ;;  %v230_v49 = vld [vmem:[#allocation1 + $0x38] sm:$0xff] }
  0x21   :  { %231 = vst [vmem:[%s332_s1 + $0x38] sm:$0xff] %v230_v49 }

// kernel: spectral_conv2d_forward.3
= control target key start
LH: loop header
LB: loop body
LE: loop exit
PB: predicated region body
PF: predicated region fallthrough
CT: control target
= control target key end

     0   :  { %v865_v0 = vmov 3   ;;  %v866_v1 = vmov 1   ;;  %v867_v4 = vmov 0   ;;  %v868_v6 = vmov 2   ;;  %s1445_s2 = inlined_call_operand.vmem [shape: f32[8,1], index: 2, kind: input, shape index: {}]   ;;  %s1446_s1 = inlined_call_operand.vmem [shape: f32[8,4], index: 1, kind: input, shape index: {}]   ;;  %s1447_s4 = inlined_call_operand.vmem [shape: f32[4,1], index: 4, kind: input, shape index: {}]   ;;  %s1448_s3 = inlined_call_operand.vmem [shape: f32[4,8], index: 3, kind: input, shape index: {}]   ;;  %s1449_s8 = inlined_call_operand.vmem [shape: f32[8,1], index: 8, kind: input, shape index: {}]   ;;  %s1450_s7 = inlined_call_operand.vmem [shape: f32[8,4], index: 7, kind: input, shape index: {}]   ;;  %s1451_s9 = inlined_call_operand.vmem [shape: f32[4,8], index: 9, kind: input, shape index: {}]   ;;  %s1452_s10 = inlined_call_operand.vmem [shape: f32[4,1], index: 10, kind: input, shape index: {}]   ;;  %s1453_s5 = inlined_call_operand.vmem [shape: f32[4,1], index: 5, kind: input, shape index: {}]   ;;  %s1454_s6 = inlined_call_operand.vmem [shape: f32[4,1], index: 6, kind: input, shape index: {}]   ;;  %s1455_s0 = inlined_call_operand.vmem [shape: f32[4,512], index: 0, kind: input, shape index: {}]   ;;  %s1456_s11 = inlined_call_operand.vmem [shape: f32[4,1], index: 11, kind: input, shape index: {}]   ;;  %s1457_s12 = inlined_call_operand.vmem [shape: f32[4,1], index: 12, kind: input, shape index: {}]   ;;  %s1458_s13 = inlined_call_operand.vmem [shape: f32[4,512], index: 13, kind: output, shape index: {0}]   ;;  %s1459_s14 = inlined_call_operand.vmem [shape: f32[4,512], index: 14, kind: output, shape index: {1}]  }
   0x1   :  { %822 = vset.pattern.permute.xlu2 %v865_v0  ;;  %820 = vset.pattern.permute.xlu1 %v866_v1  ;;  %v47_v2 = vld [vmem:[%s1445_s2] sm:$0xff]  ;;  %v869_v12 = vmov 5   ;;  %v870_v13 = vmov 7   ;;  %v871_v14 = vmov 4   ;;  %v872_v15 = vmov 6   ;;  %v59_v22 = vld [vmem:[%s1455_s0 + $0x8] sm:$0xff] }
   0x2   :  { %v46_v3 = vld [vmem:[%s1446_s1] sm:$0xff]  ;;  %819 = vset.pattern.permute.xlu0 %v867_v4  ;;  %v74_v27 = vperm.slane %v59_v22, 0  ;;  %v75_v28 = vperm.slane %v59_v22, 4  ;;  %v98_v31 = vperm.slane %v59_v22, 1  ;;  %v99_v32 = vperm.slane %v59_v22, 5 }
   0x3   :  { %141 = vperm.xlu2 %822, %v46_v3   ;;  %62 = vperm.xlu0 %819, %v47_v2   ;;  %v49_v5 = vld [vmem:[%s1447_s4] sm:$0xf]  ;;  %v146_v35 = vperm.slane %v59_v22, 3  ;;  %v147_v36 = vperm.slane %v59_v22, 7  ;;  %v122_v40 = vperm.slane %v59_v22, 2  ;;  %v123_v41 = vperm.slane %v59_v22, 6 }
   0x4   :  { %93 = vperm.xlu1 %820, %v46_v3   ;;  %v48_v7 = vld [vmem:[%s1448_s3] sm:$0xf]  ;;  %v1006_v44 = vperm.slane %v74_v27, 0  ;;  %v1008_v45 = vperm.slane %v75_v28, 0  ;;  %v1014_v48 = vperm.slane %v98_v31, 1  ;;  %v1016_v49 = vperm.slane %v99_v32, 1 }
   0x5   :  { %v53_v8 = vld [vmem:[%s1449_s8] sm:$0xff]  ;;  %v1022_v52 = vperm.slane %v146_v35, 3  ;;  %v1024_v53 = vperm.slane %v147_v36, 3  ;;  %v1030_v57 = vperm.slane %v122_v40, 2  ;;  %v1032_v58 = vperm.slane %v123_v41, 2 }
   0x6   :  { %v52_v9 = vld [vmem:[%s1450_s7] sm:$0xff]  ;;  %vm302_vm0 = vcmask 1043456  }
   0x7   :  { %v54_v10 = vld [vmem:[%s1451_s9] sm:$0xf] }
   0x8   :  { %v55_v11 = vld [vmem:[%s1452_s10] sm:$0xf] }
   0x9   :  { %v50_v17 = vld [vmem:[%s1453_s5] sm:$0xf] }
   0xa   :  { %v51_v18 = vld [vmem:[%s1454_s6] sm:$0xf] }
   0xb   :  { %823 = vset.pattern.permute.xlu2 %v867_v4  ;;  %67 = vperm.xlu0 %819, %v46_v3   ;;  %v58_v21 = vld [vmem:[%s1455_s0] sm:$0xff] }
   0xc   :  { %821 = vset.pattern.permute.xlu1 %v868_v6  ;;  %170 = vperm.xlu2 %823, %v49_v5   ;;  %v72_v25 = vperm.slane %v58_v21, 0  ;;  %v73_v26 = vperm.slane %v58_v21, 4  ;;  %v96_v29 = vperm.slane %v58_v21, 1  ;;  %v97_v30 = vperm.slane %v58_v21, 5 }
   0xd   :  { %117 = vperm.xlu1 %821, %v46_v3   ;;  %v144_v33 = vperm.slane %v58_v21, 3  ;;  %v145_v34 = vperm.slane %v58_v21, 7  ;;  %v120_v38 = vperm.slane %v58_v21, 2  ;;  %v121_v39 = vperm.slane %v58_v21, 6 }
   0xe   :  { %v1002_v42 = vperm.slane %v72_v25, 0  ;;  %v1004_v43 = vperm.slane %v73_v26, 0  ;;  %v1010_v46 = vperm.slane %v96_v29, 1  ;;  %v1012_v47 = vperm.slane %v97_v30, 1 }
   0xf   :  { %v1018_v50 = vperm.slane %v144_v33, 3  ;;  %v1020_v51 = vperm.slane %v145_v34, 3  ;;  %v1026_v55 = vperm.slane %v120_v38, 2  ;;  %v1028_v56 = vperm.slane %v121_v39, 2 }
  0x13   :  { %175 = vperm.xlu0 %819, %v48_v7  }
  0x14   :  { %825 = vset.pattern.permute.xlu2 %v868_v6 }
  0x15   :  { %824 = vset.pattern.permute.xlu1 %v866_v1  ;;  %207 = vperm.xlu2 %825, %v48_v7  }
  0x16   :  { %191 = vperm.xlu1 %824, %v48_v7  }
  0x1b   :  { %826 = vset.pattern.permute.xlu0 %v865_v0 }
  0x1c   :  { %223 = vperm.xlu0 %826, %v48_v7  }
  0x1d   :  { %828 = vset.pattern.permute.xlu2 %v867_v4 }
  0x1e   :  { %827 = vset.pattern.permute.xlu1 %v867_v4  ;;  %462 = vperm.xlu2 %828, %v53_v8  }
  0x1f   :  { %467 = vperm.xlu1 %827, %v52_v9  }
  0x24   :  { %503 = vperm.xlu0 %826, %v52_v9  }
  0x26   :  { %830 = vset.pattern.permute.xlu2 %v868_v6 }
  0x27   :  { %829 = vset.pattern.permute.xlu1 %v866_v1  ;;  %491 = vperm.xlu2 %830, %v52_v9  }
  0x28   :  { %479 = vperm.xlu1 %829, %v52_v9  }
  0x2c   :  { %833 = vset.pattern.permute.xlu0 %v866_v1 }
  0x2d   :  { %541 = vperm.xlu0 %833, %v54_v10  }
  0x2f   :  { %832 = vset.pattern.permute.xlu2 %v867_v4 }
  0x30   :  { %831 = vset.pattern.permute.xlu1 %v867_v4  ;;  %520 = vperm.xlu2 %832, %v55_v11  }
  0x31   :  { %525 = vperm.xlu1 %831, %v54_v10  }
  0x35   :  { %838 = vset.pattern.permute.xlu0 %v869_v12 }
  0x36   :  { %255 = vperm.xlu0 %838, %v48_v7  }
  0x38   :  { %835 = vset.pattern.permute.xlu2 %v865_v0 }
  0x39   :  { %834 = vset.pattern.permute.xlu1 %v868_v6  ;;  %573 = vperm.xlu2 %835, %v54_v10  }
  0x3a   :  { %557 = vperm.xlu1 %834, %v54_v10  }
  0x3e   :  { %843 = vset.pattern.permute.xlu0 %v870_v13 }
  0x3f   :  { %637 = vperm.xlu0 %843, %v54_v10  }
  0x41   :  { %837 = vset.pattern.permute.xlu2 %v871_v14 }
  0x42   :  { %836 = vset.pattern.permute.xlu1 %v871_v14  ;;  %589 = vperm.xlu2 %837, %v54_v10  }
  0x43   :  { %239 = vperm.xlu1 %836, %v48_v7  }
  0x47   :  { %846 = vset.pattern.permute.xlu0 %v867_v4 }
  0x4a   :  { %840 = vset.pattern.permute.xlu2 %v872_v15 }
  0x4b   :  { %839 = vset.pattern.permute.xlu1 %v869_v12  ;;  %271 = vperm.xlu2 %840, %v48_v7  }
  0x4c   :  { %605 = vperm.xlu1 %839, %v54_v10  }
  0x53   :  { %842 = vset.pattern.permute.xlu2 %v870_v13 }
  0x54   :  { %841 = vset.pattern.permute.xlu1 %v872_v15  ;;  %287 = vperm.xlu2 %842, %v48_v7  }
  0x55   :  { %621 = vperm.xlu1 %841, %v54_v10  }
  0x5c   :  { %845 = vset.pattern.permute.xlu2 %v867_v4 }
  0x5d   :  { %v980_v16 = vpop.permute.xlu2 %141  ;;  %844 = vset.pattern.permute.xlu1 %v867_v4 }
  0x5e   :  { %432 = vperm.xlu1 %844, %v50_v17   ;;  %v156_v21 = vmul.f32 %v1018_v50, %v980_v16  ;;  %v157_v22 = vmul.f32 %v1020_v51, %v980_v16 }
  0x66   :  { %v990_v19 = vpop.permute.xlu2 %170  ;;  %441 = vperm.xlu1 %844, %v51_v18   ;;  %v56_v18 = vld [vmem:[%s1456_s11] sm:$0xf] }
  0x67   :  { %774 = vperm.xlu2 %845, %v56_v18  }
  0x6f   :  { %v992_v20 = vpop.permute.xlu2 %207 }
  0x75   :  { %v63_v23 = vpop.permute.xlu0 %62 }
  0x76   :  { %v94_v24 = vpop.permute.xlu1 %93 }
  0x77   :  { %v108_v0 = vmul.f32 %v1010_v46, %v94_v24  ;;  %v109_v1 = vmul.f32 %v1012_v47, %v94_v24  ;;  %v110_v2 = vmul.f32 %v1014_v48, %v94_v24  ;;  %v111_v3 = vmul.f32 %v1016_v49, %v94_v24 }
  0x78   :  { %v1000_v37 = vpop.permute.xlu2 %462  ;;  %v159_v24 = vmul.f32 %v1024_v53, %v980_v16 }
  0x7d   :  { %v68_v54 = vpop.permute.xlu0 %67 }
  0x7e   :  { %v84_v59 = vmul.f32 %v1002_v42, %v68_v54  ;;  %v85_v60 = vmul.f32 %v1004_v43, %v68_v54  ;;  %v86_v61 = vmul.f32 %v1006_v44, %v68_v54  ;;  %v87_v62 = vmul.f32 %v1008_v45, %v68_v54 }
  0x7f   :  { %v118_v63 = vpop.permute.xlu1 %117 }
  0x80   :  { %v88_v4 = vadd.f32 %v84_v59, %v63_v23  ;;  %v89_v5 = vadd.f32 %v85_v60, %v63_v23  ;;  %v90_v6 = vadd.f32 %v86_v61, %v63_v23  ;;  %v91_v7 = vadd.f32 %v87_v62, %v63_v23  ;;  %v57_v60 = vld [vmem:[%s1457_s12] sm:$0xf] }
  0x81   :  { %v132_v8 = vmul.f32 %v1026_v55, %v118_v63  ;;  %v133_v9 = vmul.f32 %v1028_v56, %v118_v63  ;;  %v134_v10 = vmul.f32 %v1030_v57, %v118_v63  ;;  %v135_v11 = vmul.f32 %v1032_v58, %v118_v63  ;;  %v492_v12 = vpop.permute.xlu2 %491  ;;  %783 = vperm.xlu2 %845, %v57_v60  }
  0x82   :  { %v112_v13 = vadd.f32 %v108_v0, %v88_v4  ;;  %v113_v14 = vadd.f32 %v109_v1, %v89_v5  ;;  %v114_v15 = vadd.f32 %v110_v2, %v90_v6  ;;  %v115_v17 = vadd.f32 %v111_v3, %v91_v7 }
  0x83   :  { %v158_v23 = vmul.f32 %v1022_v52, %v980_v16 }
  0x84   :  { %v136_v25 = vadd.f32 %v132_v8, %v112_v13  ;;  %v137_v26 = vadd.f32 %v133_v9, %v113_v14  ;;  %v138_v27 = vadd.f32 %v134_v10, %v114_v15  ;;  %v139_v28 = vadd.f32 %v135_v11, %v115_v17 }
  0x85   :  { %v176_v39 = vpop.permute.xlu0 %175  ;;  %v494_v9 = vmul.f32 %v492_v12, %v1026_v55 }
  0x86   :  { %v160_v29 = vadd.f32 %v156_v21, %v136_v25  ;;  %v161_v30 = vadd.f32 %v157_v22, %v137_v26  ;;  %v162_v31 = vadd.f32 %v158_v23, %v138_v27  ;;  %v163_v32 = vadd.f32 %v159_v24, %v139_v28 }
  0x87   :  { %v495_v22 = vmul.f32 %v492_v12, %v1028_v56  ;;  %v496_v23 = vmul.f32 %v492_v12, %v1030_v57  ;;  %v497_v24 = vmul.f32 %v492_v12, %v1032_v58 }
  0x88   :  { %v192_v33 = vpop.permute.xlu1 %191  ;;  %v1057_v34 = vmax.f32 %v160_v29, 0.0  ;;  %v1059_v35 = vmax.f32 %v161_v30, 0.0  ;;  %v1061_v36 = vmax.f32 %v162_v31, 0.0  ;;  %v1063_v38 = vmax.f32 %v163_v32, 0.0 }
  0x8a   :  { %v178_v16 = vperm.slane %v1057_v34, 0  ;;  %v179_v40 = vperm.slane %v1059_v35, 0  ;;  %v180_v41 = vperm.slane %v1061_v36, 0  ;;  %v181_v54 = vperm.slane %v1063_v38, 0  ;;  %v1069_v59 = vpop.permute.xlu2 %520 }
  0x8b   :  { %v194_v0 = vperm.slane %v1057_v34, 1  ;;  %v195_v1 = vperm.slane %v1059_v35, 1  ;;  %v196_v2 = vperm.slane %v1061_v36, 1  ;;  %v197_v7 = vperm.slane %v1063_v38, 1 }
  0x8c   :  { %v182_v61 = vmul.f32 %v178_v16, %v176_v39  ;;  %v183_v62 = vmul.f32 %v179_v40, %v176_v39  ;;  %v184_v63 = vmul.f32 %v180_v41, %v176_v39  ;;  %v185_v3 = vmul.f32 %v181_v54, %v176_v39 }
  0x8d   :  { %v198_v10 = vmul.f32 %v194_v0, %v192_v33  ;;  %v199_v11 = vmul.f32 %v195_v1, %v192_v33  ;;  %v200_v13 = vmul.f32 %v196_v2, %v192_v33  ;;  %v210_v17 = vperm.slane %v1057_v34, 2 }
  0x8e   :  { %v186_v4 = vadd.f32 %v182_v61, %v990_v19  ;;  %v187_v5 = vadd.f32 %v183_v62, %v990_v19  ;;  %v188_v6 = vadd.f32 %v184_v63, %v990_v19  ;;  %v189_v14 = vadd.f32 %v185_v3, %v990_v19  ;;  %v224_v15 = vpop.permute.xlu0 %223 }
  0x8f   :  { %v211_v18 = vperm.slane %v1059_v35, 2  ;;  %v212_v21 = vperm.slane %v1061_v36, 2  ;;  %v213_v55 = vperm.slane %v1063_v38, 2  ;;  %v201_v25 = vmul.f32 %v197_v7, %v192_v33 }
  0x90   :  { %v202_v26 = vadd.f32 %v198_v10, %v186_v4  ;;  %v203_v27 = vadd.f32 %v199_v11, %v187_v5  ;;  %v204_v28 = vadd.f32 %v200_v13, %v188_v6  ;;  %v214_v57 = vmul.f32 %v210_v17, %v992_v20 }
  0x91   :  { %v468_v8 = vpop.permute.xlu1 %467  ;;  %v205_v32 = vadd.f32 %v201_v25, %v189_v14  ;;  %v215_v58 = vmul.f32 %v211_v18, %v992_v20  ;;  %v216_v12 = vmul.f32 %v212_v21, %v992_v20  ;;  %v217_v33 = vmul.f32 %v213_v55, %v992_v20 }
  0x92   :  { %v470_v29 = vmul.f32 %v468_v8, %v1002_v42  ;;  %v471_v30 = vmul.f32 %v468_v8, %v1004_v43  ;;  %v472_v31 = vmul.f32 %v468_v8, %v1006_v44  ;;  %v473_v56 = vmul.f32 %v468_v8, %v1008_v45 }
  0x93   :  { %v1090_v19 = vpop.permute.xlu2 %573  ;;  %v226_v39 = vperm.slane %v1057_v34, 3  ;;  %v227_v16 = vperm.slane %v1059_v35, 3  ;;  %v228_v42 = vperm.slane %v1061_v36, 3  ;;  %v218_v43 = vadd.f32 %v214_v57, %v202_v26 }
  0x94   :  { %v219_v40 = vadd.f32 %v215_v58, %v203_v27  ;;  %v220_v44 = vadd.f32 %v216_v12, %v204_v28  ;;  %v229_v45 = vperm.slane %v1063_v38, 3  ;;  %v474_v41 = vadd.f32 %v470_v29, %v1000_v37 }
  0x95   :  { %v475_v54 = vadd.f32 %v471_v30, %v1000_v37  ;;  %v476_v60 = vadd.f32 %v472_v31, %v1000_v37  ;;  %v477_v61 = vadd.f32 %v473_v56, %v1000_v37  ;;  %v221_v11 = vadd.f32 %v217_v33, %v205_v32 }
  0x96   :  { %v504_v62 = vpop.permute.xlu0 %503  ;;  %v231_v13 = vmul.f32 %v227_v16, %v224_v15  ;;  %v274_v28 = vperm.slane %v1057_v34, 6  ;;  %v277_v30 = vperm.slane %v1063_v38, 6  ;;  %v258_v56 = vperm.slane %v1057_v34, 5 }
  0x97   :  { %v506_v3 = vmul.f32 %v504_v62, %v1018_v50  ;;  %v507_v4 = vmul.f32 %v504_v62, %v1020_v51  ;;  %v508_v5 = vmul.f32 %v504_v62, %v1022_v52  ;;  %v509_v6 = vmul.f32 %v504_v62, %v1024_v53 }
  0x98   :  { %v233_v50 = vmul.f32 %v229_v45, %v224_v15  ;;  %v1118_v51 = vadd.f32 %v231_v13, %v219_v40  ;;  %v259_v32 = vperm.slane %v1059_v35, 5  ;;  %v260_v57 = vperm.slane %v1061_v36, 5 }
  0x99   :  { %v261_v12 = vperm.slane %v1063_v38, 5  ;;  %v290_v33 = vperm.slane %v1057_v34, 7  ;;  %v292_v16 = vperm.slane %v1061_v36, 7  ;;  %v242_v45 = vperm.slane %v1057_v34, 4 }
  0x9a   :  { %v480_v20 = vpop.permute.xlu1 %479  ;;  %v1122_v27 = vadd.f32 %v233_v50, %v221_v11 }
  0x9b   :  { %v482_v63 = vmul.f32 %v480_v20, %v1010_v46  ;;  %v483_v0 = vmul.f32 %v480_v20, %v1012_v47  ;;  %v484_v1 = vmul.f32 %v480_v20, %v1014_v48  ;;  %v485_v2 = vmul.f32 %v480_v20, %v1016_v49 }
  0x9c   :  { %v230_v46 = vmul.f32 %v226_v39, %v224_v15  ;;  %v232_v47 = vmul.f32 %v228_v42, %v224_v15  ;;  %v590_v18 = vpop.permute.xlu2 %589  ;;  %v291_v39 = vperm.slane %v1059_v35, 7 }
  0x9d   :  { %v486_v7 = vadd.f32 %v482_v63, %v474_v41  ;;  %v487_v37 = vadd.f32 %v483_v0, %v475_v54  ;;  %v488_v8 = vadd.f32 %v484_v1, %v476_v60  ;;  %v489_v10 = vadd.f32 %v485_v2, %v477_v61 }
  0x9e   :  { %v1116_v21 = vadd.f32 %v230_v46, %v218_v43  ;;  %v1120_v52 = vadd.f32 %v232_v47, %v220_v44  ;;  %v293_v44 = vperm.slane %v1063_v38, 7  ;;  %v243_v41 = vperm.slane %v1059_v35, 4 }
  0x9f   :  { %v498_v14 = vadd.f32 %v494_v9, %v486_v7  ;;  %v499_v48 = vadd.f32 %v495_v22, %v487_v37  ;;  %v500_v17 = vadd.f32 %v496_v23, %v488_v8  ;;  %v501_v49 = vadd.f32 %v497_v24, %v489_v10  ;;  %v542_v58 = vpop.permute.xlu0 %541 }
  0xa0   :  { %v275_v9 = vperm.slane %v1059_v35, 6  ;;  %v276_v22 = vperm.slane %v1061_v36, 6  ;;  %v244_v54 = vperm.slane %v1061_v36, 4  ;;  %v245_v60 = vperm.slane %v1063_v38, 4 }
  0xa1   :  { %v510_v53 = vadd.f32 %v506_v3, %v498_v14  ;;  %v511_v55 = vadd.f32 %v507_v4, %v499_v48  ;;  %v512_v25 = vadd.f32 %v508_v5, %v500_v17  ;;  %v513_v26 = vadd.f32 %v509_v6, %v501_v49 }
  0xa3   :  { %v1127_v23 = vmax.f32 %v510_v53, 0.0  ;;  %v1129_v15 = vmax.f32 %v511_v55, 0.0  ;;  %v1131_v24 = vmax.f32 %v512_v25, 0.0  ;;  %v526_v29 = vpop.permute.xlu1 %525  ;;  %v1134_v31 = vmax.f32 %v513_v26, 0.0 }
  0xa5   :  { %v592_v42 = vperm.slane %v1127_v23, 4  ;;  %v593_v43 = vperm.slane %v1129_v15, 4  ;;  %v594_v40 = vperm.slane %v1131_v24, 4  ;;  %v595_v61 = vperm.slane %v1134_v31, 4  ;;  %v272_v4 = vpop.permute.xlu2 %271 }
  0xa6   :  { %v544_v20 = vperm.slane %v1127_v23, 1  ;;  %v545_v62 = vperm.slane %v1129_v15, 1  ;;  %v546_v63 = vperm.slane %v1131_v24, 1  ;;  %v528_v0 = vperm.slane %v1127_v23, 0 }
  0xa7   :  { %v529_v1 = vperm.slane %v1129_v15, 0  ;;  %v530_v2 = vperm.slane %v1131_v24, 0  ;;  %v531_v3 = vperm.slane %v1134_v31, 0  ;;  %v1159_v5 = vmul.f32 %v592_v42, %v590_v18 }
  0xa8   :  { %v1161_v6 = vmul.f32 %v593_v43, %v590_v18  ;;  %v1163_v7 = vmul.f32 %v594_v40, %v590_v18  ;;  %v547_v37 = vperm.slane %v1134_v31, 1  ;;  %v532_v8 = vmul.f32 %v528_v0, %v526_v29 }
  0xa9   :  { %v533_v10 = vmul.f32 %v529_v1, %v526_v29  ;;  %v534_v11 = vmul.f32 %v530_v2, %v526_v29  ;;  %v535_v46 = vmul.f32 %v531_v3, %v526_v29  ;;  %v1166_v13 = vmul.f32 %v595_v61, %v590_v18 }
  0xaa   :  { %v548_v47 = vmul.f32 %v544_v20, %v542_v58  ;;  %v549_v14 = vmul.f32 %v545_v62, %v542_v58  ;;  %v550_v48 = vmul.f32 %v546_v63, %v542_v58  ;;  %v536_v49 = vadd.f32 %v532_v8, %v1069_v59  ;;  %v256_v20 = vpop.permute.xlu0 %255 }
  0xab   :  { %v537_v50 = vadd.f32 %v533_v10, %v1069_v59  ;;  %v538_v53 = vadd.f32 %v534_v11, %v1069_v59  ;;  %v539_v55 = vadd.f32 %v535_v46, %v1069_v59  ;;  %v560_v25 = vperm.slane %v1127_v23, 2 }
  0xac   :  { %v558_v17 = vpop.permute.xlu1 %557  ;;  %v561_v26 = vperm.slane %v1129_v15, 2  ;;  %v562_v29 = vperm.slane %v1131_v24, 2  ;;  %v563_v18 = vperm.slane %v1134_v31, 2  ;;  %v551_v42 = vmul.f32 %v547_v37, %v542_v58 }
  0xad   :  { %v278_v43 = vmul.f32 %v274_v28, %v272_v4  ;;  %v279_v40 = vmul.f32 %v275_v9, %v272_v4  ;;  %v280_v61 = vmul.f32 %v276_v22, %v272_v4  ;;  %v564_v62 = vmul.f32 %v560_v25, %v558_v17 }
  0xae   :  { %v565_v63 = vmul.f32 %v561_v26, %v558_v17  ;;  %v566_v0 = vmul.f32 %v562_v29, %v558_v17  ;;  %v567_v1 = vmul.f32 %v563_v18, %v558_v17  ;;  %v552_v2 = vadd.f32 %v548_v47, %v536_v49  ;;  %v288_v47 = vpop.permute.xlu2 %287 }
  0xaf   :  { %v576_v59 = vperm.slane %v1127_v23, 3  ;;  %v577_v3 = vperm.slane %v1129_v15, 3  ;;  %v578_v8 = vperm.slane %v1131_v24, 3  ;;  %v553_v10 = vadd.f32 %v549_v14, %v537_v50 }
  0xb0   :  { %v554_v11 = vadd.f32 %v550_v48, %v538_v53  ;;  %v555_v46 = vadd.f32 %v551_v42, %v539_v55  ;;  %v579_v58 = vperm.slane %v1134_v31, 3  ;;  %v281_v28 = vmul.f32 %v277_v30, %v272_v4 }
  0xb1   :  { %v262_v9 = vmul.f32 %v258_v56, %v256_v20  ;;  %v263_v22 = vmul.f32 %v259_v32, %v256_v20  ;;  %v264_v37 = vmul.f32 %v260_v57, %v256_v20  ;;  %v568_v17 = vadd.f32 %v564_v62, %v552_v2 }
  0xb2   :  { %v569_v49 = vadd.f32 %v565_v63, %v553_v10  ;;  %v570_v14 = vadd.f32 %v566_v0, %v554_v11  ;;  %v571_v48 = vadd.f32 %v567_v1, %v555_v46  ;;  %v265_v50 = vmul.f32 %v261_v12, %v256_v20  ;;  %v638_v20 = vpop.permute.xlu0 %637 }
  0xb3   :  { %v580_v53 = vmul.f32 %v576_v59, %v1090_v19  ;;  %v581_v30 = vmul.f32 %v577_v3, %v1090_v19  ;;  %v582_v56 = vmul.f32 %v578_v8, %v1090_v19  ;;  %v583_v32 = vmul.f32 %v579_v58, %v1090_v19 }
  0xb4   :  { %v294_v57 = vmul.f32 %v290_v33, %v288_v47  ;;  %v295_v55 = vmul.f32 %v291_v39, %v288_v47  ;;  %v296_v25 = vmul.f32 %v292_v16, %v288_v47  ;;  %v640_v36 = vperm.slane %v1127_v23, 7 }
  0xb5   :  { %v240_v4 = vpop.permute.xlu1 %239  ;;  %v584_v33 = vadd.f32 %v580_v53, %v568_v17  ;;  %v585_v18 = vadd.f32 %v581_v30, %v569_v49  ;;  %v586_v42 = vadd.f32 %v582_v56, %v570_v14  ;;  %v587_v39 = vadd.f32 %v583_v32, %v571_v48 }
  0xb6   :  { %v246_v12 = vmul.f32 %v242_v45, %v240_v4  ;;  %v247_v26 = vmul.f32 %v243_v41, %v240_v4  ;;  %v248_v29 = vmul.f32 %v244_v54, %v240_v4  ;;  %v249_v19 = vmul.f32 %v245_v60, %v240_v4 }
  0xb7   :  { %v641_v41 = vperm.slane %v1129_v15, 7  ;;  %v642_v54 = vperm.slane %v1131_v24, 7  ;;  %v643_v60 = vperm.slane %v1134_v31, 7  ;;  %v600_v46 = vadd.f32 %v1159_v5, %v584_v33 }
  0xb8   :  { %v250_v16 = vadd.f32 %v246_v12, %v1116_v21  ;;  %v251_v34 = vadd.f32 %v247_v26, %v1118_v51  ;;  %v252_v45 = vadd.f32 %v248_v29, %v1120_v52  ;;  %v253_v35 = vadd.f32 %v249_v19, %v1122_v27 }
  0xb9   :  { %v297_v21 = vmul.f32 %v293_v44, %v288_v47  ;;  %v1218_v51 = vmul.f32 %v640_v36, %v638_v20  ;;  %v1220_v52 = vmul.f32 %v641_v41, %v638_v20  ;;  %v1222_v27 = vmul.f32 %v642_v54, %v638_v20 }
  0xba   :  { %v266_v62 = vadd.f32 %v262_v9, %v250_v16  ;;  %v267_v63 = vadd.f32 %v263_v22, %v251_v34  ;;  %v268_v0 = vadd.f32 %v264_v37, %v252_v45  ;;  %v269_v1 = vadd.f32 %v265_v50, %v253_v35 }
  0xbb   :  { %v1224_v2 = vmul.f32 %v643_v60, %v638_v20  ;;  %v601_v58 = vadd.f32 %v1161_v6, %v585_v18  ;;  %v602_v38 = vadd.f32 %v1163_v7, %v586_v42  ;;  %v603_v44 = vadd.f32 %v1166_v13, %v587_v39 }
  0xbc   :  { %v282_v59 = vadd.f32 %v278_v43, %v266_v62  ;;  %v283_v3 = vadd.f32 %v279_v40, %v267_v63  ;;  %v284_v8 = vadd.f32 %v280_v61, %v268_v0  ;;  %v285_v10 = vadd.f32 %v281_v28, %v269_v1 }
  0xbd   :  { %v608_v9 = vperm.slane %v1127_v23, 5  ;;  %v609_v22 = vperm.slane %v1129_v15, 5  ;;  %v610_v37 = vperm.slane %v1131_v24, 5  ;;  %v611_v5 = vperm.slane %v1134_v31, 5 }
  0xbe   :  { %v606_v11 = vpop.permute.xlu1 %605  ;;  %v1233_v47 = vadd.f32 %v294_v57, %v282_v59  ;;  %v1235_v43 = vadd.f32 %v295_v55, %v283_v3  ;;  %v1237_v40 = vadd.f32 %v296_v25, %v284_v8  ;;  %v873_v7 = vmov 4.0  }
  0xbf   :  { %v612_v61 = vmul.f32 %v608_v9, %v606_v11  ;;  %v613_v6 = vmul.f32 %v609_v22, %v606_v11  ;;  %v614_v28 = vmul.f32 %v610_v37, %v606_v11  ;;  %847 = vrcp.f32 %v873_v7 }
  0xc0   :  { %v1240_v13 = vadd.f32 %v297_v21, %v285_v10  ;;  %v303_v17 = vsel %vm302_vm0, %v1233_v47, 0.0  ;;  %v310_v49 = vsel %vm302_vm0, %v1235_v43, 0.0  ;;  %v615_v14 = vmul.f32 %v611_v5, %v606_v11 }
  0xc1   :  { %v304_v48 = vrot.slane %v303_v17, 4  ;;  %v311_v50 = vrot.slane %v310_v49, 4  ;;  %v317_v53 = vsel %vm302_vm0, %v1237_v40, 0.0  ;;  %v624_v30 = vperm.slane %v1127_v23, 6 }
  0xc2   :  { %v625_v56 = vperm.slane %v1129_v15, 6  ;;  %v318_v4 = vrot.slane %v317_v53, 4  ;;  %v324_v32 = vsel %vm302_vm0, %v1240_v13, 0.0  ;;  %v626_v57 = vperm.slane %v1131_v24, 6 }
  0xc3   :  { %v305_v55 = vadd.f32 %v304_v48, %v303_v17  ;;  %v312_v25 = vadd.f32 %v311_v50, %v310_v49  ;;  %v325_v12 = vrot.slane %v324_v32, 4  ;;  %v616_v26 = vadd.f32 %v612_v61, %v600_v46 }
  0xc4   :  { %v617_v29 = vadd.f32 %v613_v6, %v601_v58  ;;  %v618_v19 = vadd.f32 %v614_v28, %v602_v38  ;;  %v627_v33 = vperm.slane %v1134_v31, 6  ;;  %v619_v18 = vadd.f32 %v615_v14, %v603_v44 }
  0xc5   :  { %v306_v39 = vrot.slane %v305_v55, 2  ;;  %v313_v23 = vrot.slane %v312_v25, 2  ;;  %v319_v20 = vadd.f32 %v318_v4, %v317_v53  ;;  %v848_v15 = vpop.eup %847  ;;  %v326_v54 = vadd.f32 %v325_v12, %v324_v32 }
  0xc6   :  { %v332_v36 = vmul.f32 4.0, %v848_v15  ;;  %vm336_vm1 = vweird.f32 %v848_v15 }
  0xc7   :  { %v622_v42 = vpop.permute.xlu1 %621  ;;  %v307_v24 = vadd.f32 %v306_v39, %v305_v55  ;;  %v314_v41 = vadd.f32 %v313_v23, %v312_v25  ;;  %v320_v59 = vrot.slane %v319_v20, 2  ;;  %v327_v28 = vrot.slane %v326_v54, 2 }
  0xc8   :  { %v628_v16 = vmul.f32 %v624_v30, %v622_v42  ;;  %v629_v34 = vmul.f32 %v625_v56, %v622_v42  ;;  %v630_v45 = vmul.f32 %v626_v57, %v622_v42  ;;  %v631_v35 = vmul.f32 %v627_v33, %v622_v42 }
  0xc9   :  { %v333_v1 = vsub.f32 1.0, %v332_v36  ;;  %v308_v31 = vrot.slane %v307_v24, 1  ;;  %v315_v21 = vrot.slane %v314_v41, 1  ;;  %v321_v38 = vadd.f32 %v320_v59, %v319_v20 }
  0xca   :  { %v632_v60 = vadd.f32 %v628_v16, %v616_v26  ;;  %v633_v62 = vadd.f32 %v629_v34, %v617_v29  ;;  %v634_v63 = vadd.f32 %v630_v45, %v618_v19  ;;  %v635_v0 = vadd.f32 %v631_v35, %v619_v18 }
  0xcb   :  { %v334_v46 = vmul.f32 %v848_v15, %v333_v1  ;;  %v309_v58 = vadd.f32 %v308_v31, %v307_v24  ;;  %v316_v61 = vadd.f32 %v315_v21, %v314_v41  ;;  %v322_v6 = vrot.slane %v321_v38, 1 }
  0xcc   :  { %v1255_v3 = vadd.f32 %v1218_v51, %v632_v60  ;;  %v1258_v8 = vadd.f32 %v1220_v52, %v633_v62  ;;  %v1261_v10 = vadd.f32 %v1222_v27, %v634_v63  ;;  %v1264_v11 = vadd.f32 %v1224_v2, %v635_v0 }
  0xcd   :  { %v335_v5 = vadd.f32 %v848_v15, %v334_v46  ;;  %v323_v50 = vadd.f32 %v322_v6, %v321_v38  ;;  %v328_v53 = vadd.f32 %v327_v28, %v326_v54 }
  0xce   :  { %v652_v44 = vsel %vm302_vm0, %v1255_v3, 0.0  ;;  %v659_v51 = vsel %vm302_vm0, %v1258_v8, 0.0  ;;  %v666_v52 = vsel %vm302_vm0, %v1261_v10, 0.0  ;;  %v673_v27 = vsel %vm302_vm0, %v1264_v11, 0.0 }
  0xcf   :  { %v653_v9 = vrot.slane %v652_v44, 4  ;;  %v660_v22 = vrot.slane %v659_v51, 4  ;;  %v667_v2 = vrot.slane %v666_v52, 4  ;;  %v674_v37 = vrot.slane %v673_v27, 4 }
  0xd0   :  { %v1275_v48 = vsel %vm336_vm1, %v848_v15, %v335_v5  ;;  %v329_v57 = vrot.slane %v328_v53, 1 }
  0xd1   :  { %v654_v7 = vadd.f32 %v653_v9, %v652_v44  ;;  %v661_v17 = vadd.f32 %v660_v22, %v659_v51  ;;  %v668_v49 = vadd.f32 %v667_v2, %v666_v52  ;;  %v675_v14 = vadd.f32 %v674_v37, %v673_v27 }
  0xd2   :  { %v338_v55 = vmul.f32 %v1275_v48, %v309_v58  ;;  %v339_v25 = vmul.f32 %v1275_v48, %v316_v61  ;;  %v340_v12 = vmul.f32 %v1275_v48, %v323_v50  ;;  %v330_v18 = vadd.f32 %v329_v57, %v328_v53 }
  0xd3   :  { %v655_v30 = vrot.slane %v654_v7, 2  ;;  %v662_v56 = vrot.slane %v661_v17, 2  ;;  %v669_v4 = vrot.slane %v668_v49, 2  ;;  %v676_v32 = vrot.slane %v675_v14, 2 }
  0xd4   :  { %v1281_v42 = vsub.f32 %v1233_v47, %v338_v55  ;;  %v1284_v39 = vsub.f32 %v1235_v43, %v339_v25  ;;  %v1287_v23 = vsub.f32 %v1237_v40, %v340_v12  ;;  %v341_v45 = vmul.f32 %v1275_v48, %v330_v18 }
  0xd5   :  { %v656_v26 = vadd.f32 %v655_v30, %v654_v7  ;;  %v663_v29 = vadd.f32 %v662_v56, %v661_v17  ;;  %v670_v19 = vadd.f32 %v669_v4, %v668_v49  ;;  %v677_v33 = vadd.f32 %v676_v32, %v675_v14 }
  0xd6   :  { %v346_v35 = vmul.f32 %v1281_v42, %v1281_v42  ;;  %v347_v36 = vmul.f32 %v1284_v39, %v1284_v39  ;;  %v348_v47 = vmul.f32 %v1287_v23, %v1287_v23  ;;  %v1297_v54 = vsub.f32 %v1240_v13, %v341_v45 }
  0xd7   :  { %v657_v20 = vrot.slane %v656_v26, 1  ;;  %v664_v15 = vrot.slane %v663_v29, 1  ;;  %v671_v16 = vrot.slane %v670_v19, 1  ;;  %v678_v34 = vrot.slane %v677_v33, 1 }
  0xd8   :  { %v350_v60 = vsel %vm302_vm0, %v346_v35, 0.0  ;;  %v357_v62 = vsel %vm302_vm0, %v347_v36, 0.0  ;;  %v364_v63 = vsel %vm302_vm0, %v348_v47, 0.0  ;;  %v349_v59 = vmul.f32 %v1297_v54, %v1297_v54 }
  0xd9   :  { %v658_v43 = vadd.f32 %v657_v20, %v656_v26  ;;  %v665_v24 = vadd.f32 %v664_v15, %v663_v29  ;;  %v672_v41 = vadd.f32 %v671_v16, %v670_v19  ;;  %v679_v40 = vadd.f32 %v678_v34, %v677_v33 }
  0xda   :  { %v351_v0 = vrot.slane %v350_v60, 4  ;;  %v358_v1 = vrot.slane %v357_v62, 4  ;;  %v365_v31 = vrot.slane %v364_v63, 4  ;;  %v371_v27 = vsel %vm302_vm0, %v349_v59, 0.0 }
  0xdb   :  { %v680_v21 = vmul.f32 %v658_v43, %v1275_v48  ;;  %v681_v46 = vmul.f32 %v665_v24, %v1275_v48  ;;  %v682_v58 = vmul.f32 %v672_v41, %v1275_v48  ;;  %v683_v13 = vmul.f32 %v679_v40, %v1275_v48 }
  0xdc   :  { %v352_v38 = vadd.f32 %v351_v0, %v350_v60  ;;  %v359_v44 = vadd.f32 %v358_v1, %v357_v62  ;;  %v366_v51 = vadd.f32 %v365_v31, %v364_v63  ;;  %v372_v6 = vrot.slane %v371_v27, 4 }
  0xdd   :  { %v1309_v52 = vsub.f32 %v1255_v3, %v680_v21  ;;  %v1313_v9 = vsub.f32 %v1258_v8, %v681_v46  ;;  %v1316_v22 = vsub.f32 %v1261_v10, %v682_v58  ;;  %v1319_v2 = vsub.f32 %v1264_v11, %v683_v13 }
  0xde   :  { %v353_v37 = vrot.slane %v352_v38, 2  ;;  %v360_v5 = vrot.slane %v359_v44, 2  ;;  %v367_v61 = vrot.slane %v366_v51, 2  ;;  %v373_v49 = vadd.f32 %v372_v6, %v371_v27 }
  0xdf   :  { %v688_v28 = vmul.f32 %v1309_v52, %v1309_v52  ;;  %v689_v3 = vmul.f32 %v1313_v9, %v1313_v9  ;;  %v690_v8 = vmul.f32 %v1316_v22, %v1316_v22  ;;  %v691_v10 = vmul.f32 %v1319_v2, %v1319_v2 }
  0xe0   :  { %v354_v7 = vadd.f32 %v353_v37, %v352_v38  ;;  %v361_v17 = vadd.f32 %v360_v5, %v359_v44  ;;  %v368_v11 = vadd.f32 %v367_v61, %v366_v51  ;;  %v374_v57 = vrot.slane %v373_v49, 2 }
  0xe1   :  { %v692_v14 = vsel %vm302_vm0, %v688_v28, 0.0  ;;  %v699_v50 = vsel %vm302_vm0, %v689_v3, 0.0  ;;  %v706_v53 = vsel %vm302_vm0, %v690_v8, 0.0  ;;  %v713_v30 = vsel %vm302_vm0, %v691_v10, 0.0 }
  0xe2   :  { %v355_v56 = vrot.slane %v354_v7, 1  ;;  %v362_v4 = vrot.slane %v361_v17, 1  ;;  %v369_v32 = vrot.slane %v368_v11, 1  ;;  %v693_v55 = vrot.slane %v692_v14, 4 }
  0xe3   :  { %v700_v25 = vrot.slane %v699_v50, 4  ;;  %v707_v12 = vrot.slane %v706_v53, 4  ;;  %v714_v26 = vrot.slane %v713_v30, 4  ;;  %v375_v18 = vadd.f32 %v374_v57, %v373_v49 }
  0xe4   :  { %v356_v29 = vadd.f32 %v355_v56, %v354_v7  ;;  %v363_v19 = vadd.f32 %v362_v4, %v361_v17  ;;  %v370_v33 = vadd.f32 %v369_v32, %v368_v11  ;;  %v694_v20 = vadd.f32 %v693_v55, %v692_v14  ;;  %v1359_v32 = vpop.permute.xlu1 %432 }
  0xe5   :  { %v701_v15 = vadd.f32 %v700_v25, %v699_v50  ;;  %v708_v16 = vadd.f32 %v707_v12, %v706_v53  ;;  %v715_v34 = vadd.f32 %v714_v26, %v713_v30  ;;  %v376_v45 = vrot.slane %v375_v18, 1 }
  0xe6   :  { %v378_v35 = vmul.f32 %v356_v29, %v1275_v48  ;;  %v379_v36 = vmul.f32 %v363_v19, %v1275_v48  ;;  %v380_v47 = vmul.f32 %v370_v33, %v1275_v48  ;;  %v695_v43 = vrot.slane %v694_v20, 2 }
  0xe7   :  { %v702_v24 = vrot.slane %v701_v15, 2  ;;  %v709_v41 = vrot.slane %v708_v16, 2  ;;  %v716_v40 = vrot.slane %v715_v34, 2  ;;  %v377_v60 = vadd.f32 %v376_v45, %v375_v18 }
  0xe8   :  { %v382_v62 = vadd.f32 1e-05, %v378_v35  ;;  %v1336_v63 = vadd.f32 1e-05, %v379_v36  ;;  %v1338_v0 = vadd.f32 1e-05, %v380_v47  ;;  %v696_v1 = vadd.f32 %v695_v43, %v694_v20 }
  0xe9   :  { %v703_v31 = vadd.f32 %v702_v24, %v701_v15  ;;  %v710_v21 = vadd.f32 %v709_v41, %v708_v16  ;;  %v717_v59 = vadd.f32 %v716_v40, %v715_v34  ;;  %v381_v46 = vmul.f32 %v377_v60, %v1275_v48 }
  0xea   :  { %849 = vrsqrt.f32 %v382_v62  ;;  %v697_v58 = vrot.slane %v696_v1, 1  ;;  %vm392_vm2 = vweird.f32 %v382_v62  ;;  %vm402_vm3 = vweird.f32 %v1336_v63 }
  0xeb   :  { %851 = vrsqrt.f32 %v1336_v63  ;;  %v704_v13 = vrot.slane %v703_v31, 1  ;;  %v1342_v38 = vadd.f32 1e-05, %v381_v46  ;;  %v711_v44 = vrot.slane %v710_v21, 1 }
  0xec   :  { %853 = vrsqrt.f32 %v1338_v0  ;;  %v718_v51 = vrot.slane %v717_v59, 1  ;;  %v698_v27 = vadd.f32 %v697_v58, %v696_v1  ;;  %vm412_vm6 = vweird.f32 %v1338_v0  ;;  %v442_v58 = vpop.permute.xlu1 %441 }
  0xed   :  { %v705_v37 = vadd.f32 %v704_v13, %v703_v31  ;;  %855 = vrsqrt.f32 %v1342_v38  ;;  %v712_v5 = vadd.f32 %v711_v44, %v710_v21  ;;  %vm422_vm9 = vweird.f32 %v1342_v38 }
  0xee   :  { %v719_v61 = vadd.f32 %v718_v51, %v717_v59  ;;  %v720_v6 = vmul.f32 %v698_v27, %v1275_v48  ;;  %v775_v51 = vpop.permute.xlu2 %774 }
  0xef   :  { %v721_v28 = vmul.f32 %v705_v37, %v1275_v48  ;;  %v722_v8 = vmul.f32 %v712_v5, %v1275_v48 }
  0xf0   :  { %v850_v3 = vpop.eup %849  ;;  %v723_v10 = vmul.f32 %v719_v61, %v1275_v48  ;;  %v1350_v11 = vadd.f32 1e-05, %v720_v6 }
  0xf1   :  { %v852_v7 = vpop.eup %851  ;;  %v387_v17 = vmul.f32 %v850_v3, %v382_v62  ;;  %v1352_v49 = vadd.f32 1e-05, %v721_v28  ;;  %v1355_v53 = vadd.f32 1e-05, %v722_v8  ;;  %vm393_vm4 = vweird.f32 %v850_v3 }
  0xf2   :  { %v854_v14 = vpop.eup %853  ;;  %v397_v50 = vmul.f32 %v852_v7, %v1336_v63  ;;  %857 = vrsqrt.f32 %v1350_v11  ;;  %v1361_v57 = vadd.f32 1e-05, %v723_v10  ;;  %vm403_vm5 = vweird.f32 %v852_v7  ;;  %vm394_vm8 = vmor %vm392_vm2, %vm393_vm4 }
  0xf3   :  { %v388_v30 = vmul.f32 %v850_v3, %v387_v17  ;;  %v407_v56 = vmul.f32 %v854_v14, %v1338_v0  ;;  %v856_v4 = vpop.eup %855  ;;  %859 = vrsqrt.f32 %v1352_v49  ;;  %vm413_vm7 = vweird.f32 %v854_v14  ;;  %vm404_vm11 = vmor %vm402_vm3, %vm403_vm5 }
  0xf4   :  { %v398_v48 = vmul.f32 %v852_v7, %v397_v50  ;;  %v417_v12 = vmul.f32 %v856_v4, %v1342_v38  ;;  %861 = vrsqrt.f32 %v1355_v53  ;;  %vm423_vm10 = vweird.f32 %v856_v4  ;;  %vm414_vm12 = vmor %vm412_vm6, %vm413_vm7 }
  0xf5   :  { %v389_v55 = vmul.f32 0.5, %v388_v30  ;;  %v408_v25 = vmul.f32 %v854_v14, %v407_v56  ;;  %863 = vrsqrt.f32 %v1361_v57  ;;  %vm734_vm13 = vweird.f32 %v1350_v11  ;;  %vm424_vm14 = vmor %vm422_vm9, %vm423_vm10 }
  0xf6   :  { %v399_v26 = vmul.f32 0.5, %v398_v48  ;;  %v418_v33 = vmul.f32 %v856_v4, %v417_v12  ;;  %vm744_vm15 = vweird.f32 %v1352_v49  ;;  %vm754_vm6 = vweird.f32 %v1355_v53 }
  0xf7   :  { %v390_v29 = vsub.f32 1.5, %v389_v55  ;;  %v409_v19 = vmul.f32 0.5, %v408_v25  ;;  %vm764_vm9 = vweird.f32 %v1361_v57 }
  0xf8   :  { %v400_v18 = vsub.f32 1.5, %v399_v26  ;;  %v1369_v20 = vpop.eup %857  ;;  %v419_v34 = vmul.f32 0.5, %v418_v33 }
  0xf9   :  { %v391_v15 = vmul.f32 %v850_v3, %v390_v29  ;;  %v410_v16 = vsub.f32 1.5, %v409_v19  ;;  %v1371_v45 = vpop.eup %859  ;;  %v729_v36 = vmul.f32 %v1369_v20, %v1350_v11  ;;  %vm735_vm1 = vweird.f32 %v1369_v20 }
  0xfa   :  { %v401_v35 = vmul.f32 %v852_v7, %v400_v18  ;;  %v420_v24 = vsub.f32 1.5, %v419_v34  ;;  %v739_v41 = vmul.f32 %v1371_v45, %v1352_v49  ;;  %v1382_v40 = vpop.eup %861  ;;  %vm745_vm2 = vweird.f32 %v1371_v45  ;;  %vm736_vm3 = vmor %vm734_vm13, %vm735_vm1 }
  0xfb   :  { %v395_v47 = vsel %vm394_vm8, %v850_v3, %v391_v15  ;;  %v411_v43 = vmul.f32 %v854_v14, %v410_v16  ;;  %v730_v1 = vmul.f32 %v1369_v20, %v729_v36  ;;  %v864_v46 = vpop.eup %863  ;;  %v749_v44 = vmul.f32 %v1382_v40, %v1355_v53  ;;  %vm746_vm4 = vmor %vm744_vm15, %vm745_vm2 }
  0xfc   :  { %v405_v60 = vsel %vm404_vm11, %v852_v7, %v401_v35  ;;  %v426_v62 = vmul.f32 %v395_v47, %v1281_v42  ;;  %v421_v31 = vmul.f32 %v856_v4, %v420_v24  ;;  %v740_v59 = vmul.f32 %v1371_v45, %v739_v41 }
  0xfd   :  { %v415_v63 = vsel %vm414_vm12, %v854_v14, %v411_v43  ;;  %v427_v21 = vmul.f32 %v405_v60, %v1284_v39  ;;  %v731_v13 = vmul.f32 0.5, %v730_v1  ;;  %v750_v6 = vmul.f32 %v1382_v40, %v749_v44 }
  0xfe   :  { %v428_v0 = vmul.f32 %v415_v63, %v1287_v23  ;;  %v435_v42 = vmul.f32 %v1359_v32, %v426_v62  ;;  %v425_v27 = vsel %vm424_vm14, %v856_v4, %v421_v31  ;;  %v741_v37 = vmul.f32 0.5, %v740_v59 }
  0xff   :  { %v436_v39 = vmul.f32 %v1359_v32, %v427_v21  ;;  %v429_v5 = vmul.f32 %v425_v27, %v1297_v54  ;;  %v732_v61 = vsub.f32 1.5, %v731_v13  ;;  %v759_v28 = vmul.f32 %v864_v46, %v1361_v57 }
 0x100   :  { %v742_v38 = vsub.f32 1.5, %v741_v37  ;;  %v437_v3 = vmul.f32 %v1359_v32, %v428_v0  ;;  %v444_v10 = vadd.f32 %v442_v58, %v435_v42  ;;  %v751_v14 = vmul.f32 0.5, %v750_v6 }
 0x101   :  { %v445_v23 = vadd.f32 %v442_v58, %v436_v39  ;;  %v438_v8 = vmul.f32 %v1359_v32, %v429_v5  ;;  %v733_v7 = vmul.f32 %v1369_v20, %v732_v61  ;;  %v760_v50 = vmul.f32 %v864_v46, %v759_v28 }
 0x102   :  { %v743_v54 = vmul.f32 %v1371_v45, %v742_v38  ;;  %vm755_vm5 = vweird.f32 %v1382_v40  ;;  %v752_v11 = vsub.f32 1.5, %v751_v14  ;;  %v446_v55 = vadd.f32 %v442_v58, %v437_v3 }
 0x103   :  { %v452_v17 = vrot.slane %v445_v23, 4  ;;  %v447_v30 = vadd.f32 %v442_v58, %v438_v8  ;;  %v737_v56 = vsel %vm736_vm3, %v1369_v20, %v733_v7  ;;  %v761_v48 = vmul.f32 0.5, %v760_v50  ;;  %vm756_vm8 = vmor %vm754_vm6, %vm755_vm5 }
 0x104   :  { %v747_v32 = vsel %vm746_vm4, %v1371_v45, %v743_v54  ;;  %v768_v12 = vmul.f32 %v737_v56, %v1309_v52  ;;  %v753_v49 = vmul.f32 %v1382_v40, %v752_v11  ;;  %vm765_vm7 = vweird.f32 %v864_v46  ;;  %v784_v52 = vpop.permute.xlu2 %783 }
 0x105   :  { %v454_v4 = vsel %vm302_vm0, %v444_v10, %v452_v17  ;;  %v453_v25 = vrot.slane %v447_v30, 4  ;;  %v769_v26 = vmul.f32 %v747_v32, %v1313_v9  ;;  %v762_v29 = vsub.f32 1.5, %v761_v48  ;;  %vm766_vm10 = vmor %vm764_vm9, %vm765_vm7 }
 0x106   :  { %458 = vst [vmem:[%s1458_s13] sm:$0xff] %v454_v4  ;;  %v777_v33 = vmul.f32 %v775_v51, %v768_v12  ;;  %v757_v9 = vsel %vm756_vm8, %v1382_v40, %v753_v49 }
 0x107   :  { %v455_v19 = vsel %vm302_vm0, %v446_v55, %v453_v25  ;;  %v778_v18 = vmul.f32 %v775_v51, %v769_v26  ;;  %v763_v20 = vmul.f32 %v864_v46, %v762_v29  ;;  %v770_v53 = vmul.f32 %v757_v9, %v1316_v22 }
 0x108   :  { %459 = vst [vmem:[%s1458_s13 + $0x8] sm:$0xff] %v455_v19  ;;  %v786_v45 = vadd.f32 %v784_v52, %v777_v33 }
 0x109   :  { %v787_v15 = vadd.f32 %v784_v52, %v778_v18  ;;  %v767_v16 = vsel %vm766_vm10, %v864_v46, %v763_v20  ;;  %v779_v36 = vmul.f32 %v775_v51, %v770_v53 }
 0x10a   :  { %v771_v34 = vmul.f32 %v767_v16, %v1319_v2 }
 0x10b   :  { %v794_v35 = vrot.slane %v787_v15, 4  ;;  %v788_v41 = vadd.f32 %v784_v52, %v779_v36 }
 0x10c   :  { %v780_v47 = vmul.f32 %v775_v51, %v771_v34 }
 0x10d   :  { %v796_v43 = vsel %vm302_vm0, %v786_v45, %v794_v35 }
 0x10e   :  { %800 = vst [vmem:[%s1459_s14] sm:$0xff] %v796_v43  ;;  %v789_v24 = vadd.f32 %v784_v52, %v780_v47 }
 0x110   :  { %v795_v57 = vrot.slane %v789_v24, 4 }
 0x112   :  { %v797_v40 = vsel %vm302_vm0, %v788_v41, %v795_v57 }
 0x113   :  { %801 = vst [vmem:[%s1459_s14 + $0x8] sm:$0xff] %v797_v40 }

</bundles_post_ra>
